<compile_context>
chip_gen: v6e
topology: v6e:2x2x1
jax: 0.10.0
libtpu: 0.0.40
codegen_flags: <defaults>
</compile_context>

<pallas_src>
import functools

import jax
import jax.numpy as jnp
from jax.experimental import pallas as pl
from jax.experimental.pallas import tpu as pltpu


def _round_up(x: int, m: int) -> int:
    return (x + m - 1) // m * m


def _softplus(x):
    # Numerically stable, single exp + single log1p (half the transcendentals of the
    # evaluate-both-branches jnp.where form).
    return jnp.maximum(x, 0.0) + jnp.log1p(jnp.exp(-jnp.abs(x)))


# --------------------------------------------------------------------------- kernel
def _ard_layer_kernel(x_ref, drop_ref, ard_a_ref, ard_b_ref,
                      wmu_ref, wrho_ref, epsw_ref,
                      bmu_ref, brho_ref, epsb_ref,
                      y_ref, kl_ref,
                      *, in_features: int, out_features: int, tile_out: int,
                      apply_relu: bool, use_bf16_matmul: bool):
    i = pl.program_id(0)  # OUT-tile index

    # ---- dropout + ARD scaling of the input (resident (B_pad, IN_pad) block) ------
    sp_a = _softplus(ard_a_ref[...])                       # (1, IN_pad)
    sp_b = _softplus(ard_b_ref[...])                       # (1, IN_pad)
    ard_scale = sp_a * sp_b
    x = x_ref[...] * drop_ref[...] * ard_scale             # (B_pad, IN_pad)

    # ---- reparameterized weight / bias sample for this OUT tile -------------------
    w_sigma = _softplus(wrho_ref[...])                     # (TILE_OUT, IN_pad)
    w = wmu_ref[...] + w_sigma * epsw_ref[...]
    b_sigma = _softplus(brho_ref[...])                     # (1, TILE_OUT)
    b = bmu_ref[...] + b_sigma * epsb_ref[...]

    # ---- y tile = x @ W^T + b  (contract last dims: no transposed weight copy) ----
    if use_bf16_matmul:
        x_mm = x.astype(jnp.bfloat16)
        w_mm = w.astype(jnp.bfloat16)
    else:
        x_mm, w_mm = x, w
    y = jax.lax.dot_general(x_mm, w_mm, (((1,), (1,)), ((), ())),
                            preferred_element_type=jnp.float32)
    y = y + b
    if apply_relu:
        y = jnp.maximum(y, 0.0)
    y_ref[...] = y.astype(y_ref.dtype)

    # ---- KL partial for this OUT tile (padding masked out) ------------------------
    rows, in_pad = wmu_ref.shape
    row_ids = i * tile_out + jax.lax.broadcasted_iota(jnp.int32, (rows, in_pad), 0)
    col_ids = jax.lax.broadcasted_iota(jnp.int32, (rows, in_pad), 1)
    w_mask = (row_ids < out_features) & (col_ids < in_features)
    inv_ws = 1.0 / w_sigma
    w_kl_el = 2.0 * jnp.log(w_sigma) + inv_ws * inv_ws + wmu_ref[...] * wmu_ref[...] - 1.0
    weight_kl = 0.5 * jnp.sum(jnp.where(w_mask, w_kl_el, 0.0))

    b_cols = i * tile_out + jax.lax.broadcasted_iota(jnp.int32, bmu_ref.shape, 1)
    b_mask = b_cols < out_features
    inv_bs = 1.0 / b_sigma
    b_kl_el = 2.0 * jnp.log(b_sigma) + inv_bs * inv_bs + bmu_ref[...] * bmu_ref[...] - 1.0
    bias_kl = 0.5 * jnp.sum(jnp.where(b_mask, b_kl_el, 0.0))

    # ARD term only depends on IN -> add it exactly once (on tile 0).
    a_mask = jax.lax.broadcasted_iota(jnp.int32, sp_a.shape, 1) < in_features
    ard_el = sp_a + sp_b - jnp.log(sp_a) - jnp.log(sp_b)
    ard_kl = jnp.sum(jnp.where(a_mask, ard_el, 0.0))

    kl_partial = weight_kl + bias_kl + jnp.where(i == 0, ard_kl, 0.0)
    # Lane-dense (1, TILE_OUT) store of the partial; wrapper reads lane 0 of each tile.
    kl_ref[...] = jnp.full(kl_ref.shape, kl_partial, dtype=kl_ref.dtype)


# --------------------------------------------------------------------------- glue
def _draw_layer_noise(key, batch, in_features, out_features, dropout_rate):
    k_w, k_b, k_d = jax.random.split(key, 3)
    eps_w = jax.random.normal(k_w, (out_features, in_features), jnp.float32)
    eps_b = jax.random.normal(k_b, (out_features,), jnp.float32)
    if dropout_rate > 0.0:
        keep = jax.random.bernoulli(k_d, 1.0 - dropout_rate, (batch, in_features))
        drop_scale = keep.astype(jnp.float32) / (1.0 - dropout_rate)
    else:
        drop_scale = jnp.ones((batch, in_features), jnp.float32)
    return eps_w, eps_b, drop_scale


def ard_bayesian_linear_forward(x, params, key, dropout_rate: float = 0.1,
                                apply_relu: bool = False, tile_out: int | None = None,
                                use_bf16_matmul: bool = False):
    """One ARDBayesianLinear layer (training mode). Returns (y, kl)."""
    if not (0.0 <= dropout_rate < 1.0):
        raise ValueError("dropout_rate must be in [0, 1)")
    batch, in_features = x.shape
    out_features = params["weight_mu"].shape[0]

    eps_w, eps_b, drop_scale = _draw_layer_noise(
        key, batch, in_features, out_features, dropout_rate)

    # TPU-friendly padded shapes: batch -> x8 sublanes, IN/OUT -> x128 lanes.
    b_pad = _round_up(max(batch, 1), 8)
    in_pad = _round_up(in_features, 128)
    out_pad128 = _round_up(out_features, 128)
    if tile_out is None:
        tile_out = min(256, out_pad128)     # keep weight tiles small enough for v7x VMEM
    out_pad = _round_up(out_features, tile_out)
    n_tiles = out_pad // tile_out

    def pad2(a, r, c):
        a = a.astype(jnp.float32)
        return jnp.pad(a, ((0, r - a.shape[0]), (0, c - a.shape[1])))

    x_p = pad2(x, b_pad, in_pad)
    drop_p = pad2(drop_scale, b_pad, in_pad)
    ard_a = pad2(params["ard_alpha"].reshape(1, -1), 1, in_pad)
    ard_b = pad2(params["ard_beta"].reshape(1, -1), 1, in_pad)
    wmu = pad2(params["weight_mu"], out_pad, in_pad)
    wrho = pad2(params["weight_rho"], out_pad, in_pad)
    epsw = pad2(eps_w, out_pad, in_pad)
    bmu = pad2(params["bias_mu"].reshape(1, -1), 1, out_pad)
    brho = pad2(params["bias_rho"].reshape(1, -1), 1, out_pad)
    epsb = pad2(eps_b.reshape(1, -1), 1, out_pad)

    kernel = functools.partial(
        _ard_layer_kernel,
        in_features=in_features, out_features=out_features, tile_out=tile_out,
        apply_relu=apply_relu, use_bf16_matmul=use_bf16_matmul)

    resident = lambda i: (0, 0)        # held in VMEM across all OUT tiles (no re-DMA)
    per_tile_rows = lambda i: (i, 0)   # (TILE_OUT, IN_pad) weight-sized streams
    per_tile_cols = lambda i: (0, i)   # (1, TILE_OUT) / (B_pad, TILE_OUT) blocks

    y_p, kl_rows = pl.pallas_call(
        kernel,
        grid=(n_tiles,),
        in_specs=[
            pl.BlockSpec((b_pad, in_pad), resident),          # x
            pl.BlockSpec((b_pad, in_pad), resident),          # dropout keep*1/(1-p)
            pl.BlockSpec((1, in_pad), resident),              # ard_alpha
            pl.BlockSpec((1, in_pad), resident),              # ard_beta
            pl.BlockSpec((tile_out, in_pad), per_tile_rows),  # weight_mu
            pl.BlockSpec((tile_out, in_pad), per_tile_rows),  # weight_rho
            pl.BlockSpec((tile_out, in_pad), per_tile_rows),  # eps_w
            pl.BlockSpec((1, tile_out), per_tile_cols),       # bias_mu
            pl.BlockSpec((1, tile_out), per_tile_cols),       # bias_rho
            pl.BlockSpec((1, tile_out), per_tile_cols),       # eps_b
        ],
        out_specs=(
            pl.BlockSpec((b_pad, tile_out), per_tile_cols),   # y (lane-dense)
            pl.BlockSpec((1, tile_out), per_tile_cols),       # per-tile KL partials
        ),
        out_shape=(
            jax.ShapeDtypeStruct((b_pad, out_pad), jnp.float32),
            jax.ShapeDtypeStruct((1, out_pad), jnp.float32),
        ),
        compiler_params=pltpu.CompilerParams(
            dimension_semantics=("parallel",),        # shard OUT tiles across TCs (v7x)
            vmem_limit_bytes=64 * 1024 * 1024,
        ),
    )(x_p, drop_p, ard_a, ard_b, wmu, wrho, epsw, bmu, brho, epsb)

    y = y_p[:batch, :out_features]
    kl = jnp.sum(kl_rows.reshape(n_tiles, tile_out)[:, 0])
    return y, kl


def ard_neural_network_forward(x, net_params, key, dropout_rate: float = 0.1):
    """Full ARDNeuralNetwork forward: layers with ReLU in-between, summed KL."""
    n_layers = len(net_params)
    keys = jax.random.split(key, n_layers)
    kl_sum = jnp.float32(0.0)
    h = x
    for li in range(n_layers):
        is_last = li == n_layers - 1
        h, kl = ard_bayesian_linear_forward(
            h, net_params[li], keys[li], dropout_rate, apply_relu=not is_last)
        kl_sum = kl_sum + kl
    return h, kl_sum


# ----------------------------------------------------------------- init + reference
def init_ard_bayesian_linear_params(key, in_features: int, out_features: int):
    """Mirrors ARDBayesianLinear.reset_parameters."""
    k_w, k_b = jax.random.split(key, 2)
    bound_w = 1.0 / jnp.sqrt(jnp.float32(in_features))   # kaiming_uniform_(a=sqrt(5))
    return dict(
        weight_mu=jax.random.uniform(k_w, (out_features, in_features),
                                     jnp.float32, -bound_w, bound_w),
        weight_rho=jnp.full((out_features, in_features), -5.0, jnp.float32),
        bias_mu=jax.random.uniform(k_b, (out_features,), jnp.float32, -0.1, 0.1),
        bias_rho=jnp.full((out_features,), -5.0, jnp.float32),
        ard_alpha=jnp.ones((in_features,), jnp.float32),
        ard_beta=jnp.ones((in_features,), jnp.float32),
    )


def init_ard_network_params(key, input_dim, hidden_dims, output_dim):
    dims = [input_dim] + list(hidden_dims) + [output_dim]
    keys = jax.random.split(key, len(dims) - 1)
    return [init_ard_bayesian_linear_params(keys[i], dims[i], dims[i + 1])
            for i in range(len(dims) - 1)]


def _reference_layer(x, params, key, dropout_rate, apply_relu):
    """Pure-JAX reference matching the PyTorch forward (same noise as the kernel)."""
    batch, in_features = x.shape
    out_features = params["weight_mu"].shape[0]
    eps_w, eps_b, drop_scale = _draw_layer_noise(
        key, batch, in_features, out_features, dropout_rate)
    w_sigma = jax.nn.softplus(params["weight_rho"])
    b_sigma = jax.nn.softplus(params["bias_rho"])
    w = params["weight_mu"] + w_sigma * eps_w
    b = params["bias_mu"] + b_sigma * eps_b
    sa = jax.nn.softplus(params["ard_alpha"])
    sb = jax.nn.softplus(params["ard_beta"])
    xs = x * drop_scale * (sa * sb)
    y = xs @ w.T + b
    if apply_relu:
        y = jnp.maximum(y, 0.0)
    weight_kl = 0.5 * jnp.sum(jnp.log(w_sigma ** 2) + 1.0 / w_sigma ** 2
                              + params["weight_mu"] ** 2 - 1.0)
    bias_kl = 0.5 * jnp.sum(jnp.log(b_sigma ** 2) + 1.0 / b_sigma ** 2
                            + params["bias_mu"] ** 2 - 1.0)
    ard_kl = jnp.sum(sa + sb - jnp.log(sa) - jnp.log(sb))
    return y, weight_kl + bias_kl + ard_kl


# ------------------------------------------------------------------------------ main
if __name__ == "__main__":
    INPUT_DIM, HIDDEN_DIMS, OUTPUT_DIM, BATCH = 32, [384, 32], 16, 4

    root = jax.random.PRNGKey(0)
    k_params, k_x, k_fwd, k_layer = jax.random.split(root, 4)

    net_params = init_ard_network_params(k_params, INPUT_DIM, HIDDEN_DIMS, OUTPUT_DIM)
    x = jax.random.normal(k_x, (BATCH, INPUT_DIM), jnp.float32)

    # Single-layer numerical sanity check vs a pure-JAX reference (same noise; the
    # first layer has OUT=384 -> 2 OUT tiles, exercising tiling / KL partials / masks).
    y1, kl1 = ard_bayesian_linear_forward(x, net_params[0], k_layer,
                                          dropout_rate=0.1, apply_relu=True)
    y1_ref, kl1_ref = _reference_layer(x, net_params[0], k_layer,
                                       dropout_rate=0.1, apply_relu=True)
    jax.block_until_ready((y1, kl1))
    assert y1.shape == y1_ref.shape
    assert bool(jnp.allclose(y1, y1_ref, rtol=5e-2, atol=5e-2))
    assert bool(jnp.allclose(kl1, kl1_ref, rtol=1e-3))

    # Full network forward (KL summed across the three layers).
    y, kl_sum = ard_neural_network_forward(x, net_params, k_fwd, dropout_rate=0.1)
    jax.block_until_ready((y, kl_sum))
    assert y.shape == (BATCH, OUTPUT_DIM)
    assert kl_sum.shape == ()
    assert bool(jnp.all(jnp.isfinite(y))) and bool(jnp.isfinite(kl_sum))

    print("KERNEL_OK")
</pallas_src>

<mosaic_0001>
module attributes {stable_mosaic.version = 11 : i64} {
  func.func @_ard_layer_kernel(%arg0: i32, %arg1: memref<8x128xf32, #tpu.memory_space<vmem>>, %arg2: memref<8x128xf32, #tpu.memory_space<vmem>>, %arg3: memref<1x128xf32, #tpu.memory_space<vmem>>, %arg4: memref<1x128xf32, #tpu.memory_space<vmem>>, %arg5: memref<256x128xf32, #tpu.memory_space<vmem>>, %arg6: memref<256x128xf32, #tpu.memory_space<vmem>>, %arg7: memref<256x128xf32, #tpu.memory_space<vmem>>, %arg8: memref<1x256xf32, #tpu.memory_space<vmem>>, %arg9: memref<1x256xf32, #tpu.memory_space<vmem>>, %arg10: memref<1x256xf32, #tpu.memory_space<vmem>>, %arg11: memref<8x256xf32, #tpu.memory_space<vmem>>, %arg12: memref<1x256xf32, #tpu.memory_space<vmem>>) attributes {dimension_semantics = [#tpu.dimension_semantics<parallel>], iteration_bounds = array<i64: 2>, scalar_prefetch = 0 : i64, scratch_operands = 0 : i64, tpu.core_type = #tpu.core_type<tc>, window_params = [{pipeline_mode = #tpu.pipeline_mode<synchronous>, transform_indices = @transform_0, window_bounds = array<i64: 8, 128>}, {pipeline_mode = #tpu.pipeline_mode<synchronous>, transform_indices = @transform_1, window_bounds = array<i64: 8, 128>}, {pipeline_mode = #tpu.pipeline_mode<synchronous>, transform_indices = @transform_2, window_bounds = array<i64: 1, 128>}, {pipeline_mode = #tpu.pipeline_mode<synchronous>, transform_indices = @transform_3, window_bounds = array<i64: 1, 128>}, {transform_indices = @transform_4, window_bounds = array<i64: 256, 128>}, {transform_indices = @transform_5, window_bounds = array<i64: 256, 128>}, {transform_indices = @transform_6, window_bounds = array<i64: 256, 128>}, {transform_indices = @transform_7, window_bounds = array<i64: 1, 256>}, {transform_indices = @transform_8, window_bounds = array<i64: 1, 256>}, {transform_indices = @transform_9, window_bounds = array<i64: 1, 256>}, {transform_indices = @transform_10, window_bounds = array<i64: 8, 256>}, {transform_indices = @transform_11, window_bounds = array<i64: 1, 256>}]} {
    %c0 = arith.constant 0 : index
    %c0_0 = arith.constant 0 : index
    %0 = vector.load %arg3[%c0, %c0_0] : memref<1x128xf32, #tpu.memory_space<vmem>>, vector<1x128xf32>
    %cst = arith.constant 0.000000e+00 : f32
    %1 = vector.broadcast %cst : f32 to vector<1x128xf32>
    %2 = arith.maximumf %0, %1 : vector<1x128xf32>
    %3 = math.absf %0 : vector<1x128xf32>
    %cst_1 = arith.constant 0.000000e+00 : f32
    %4 = vector.broadcast %cst_1 : f32 to vector<1x128xf32>
    %5 = arith.subf %4, %3 : vector<1x128xf32>
    %6 = math.exp %5 : vector<1x128xf32>
    %7 = math.log1p %6 : vector<1x128xf32>
    %8 = arith.addf %2, %7 : vector<1x128xf32>
    %c0_2 = arith.constant 0 : index
    %c0_3 = arith.constant 0 : index
    %9 = vector.load %arg4[%c0_2, %c0_3] : memref<1x128xf32, #tpu.memory_space<vmem>>, vector<1x128xf32>
    %cst_4 = arith.constant 0.000000e+00 : f32
    %10 = vector.broadcast %cst_4 : f32 to vector<1x128xf32>
    %11 = arith.maximumf %9, %10 : vector<1x128xf32>
    %12 = math.absf %9 : vector<1x128xf32>
    %cst_5 = arith.constant 0.000000e+00 : f32
    %13 = vector.broadcast %cst_5 : f32 to vector<1x128xf32>
    %14 = arith.subf %13, %12 : vector<1x128xf32>
    %15 = math.exp %14 : vector<1x128xf32>
    %16 = math.log1p %15 : vector<1x128xf32>
    %17 = arith.addf %11, %16 : vector<1x128xf32>
    %18 = arith.mulf %8, %17 : vector<1x128xf32>
    %c0_6 = arith.constant 0 : index
    %c0_7 = arith.constant 0 : index
    %19 = vector.load %arg1[%c0_6, %c0_7] : memref<8x128xf32, #tpu.memory_space<vmem>>, vector<8x128xf32>
    %c0_8 = arith.constant 0 : index
    %c0_9 = arith.constant 0 : index
    %20 = vector.load %arg2[%c0_8, %c0_9] : memref<8x128xf32, #tpu.memory_space<vmem>>, vector<8x128xf32>
    %21 = arith.mulf %19, %20 : vector<8x128xf32>
    %22 = vector.broadcast %18 : vector<1x128xf32> to vector<8x128xf32>
    %23 = arith.mulf %21, %22 : vector<8x128xf32>
    %c0_10 = arith.constant 0 : index
    %c0_11 = arith.constant 0 : index
    %24 = vector.load %arg6[%c0_10, %c0_11] : memref<256x128xf32, #tpu.memory_space<vmem>>, vector<256x128xf32>
    %cst_12 = arith.constant 0.000000e+00 : f32
    %25 = vector.broadcast %cst_12 : f32 to vector<256x128xf32>
    %26 = arith.maximumf %24, %25 : vector<256x128xf32>
    %27 = math.absf %24 : vector<256x128xf32>
    %cst_13 = arith.constant 0.000000e+00 : f32
    %28 = vector.broadcast %cst_13 : f32 to vector<256x128xf32>
    %29 = arith.subf %28, %27 : vector<256x128xf32>
    %30 = math.exp %29 : vector<256x128xf32>
    %31 = math.log1p %30 : vector<256x128xf32>
    %32 = arith.addf %26, %31 : vector<256x128xf32>
    %c0_14 = arith.constant 0 : index
    %c0_15 = arith.constant 0 : index
    %33 = vector.load %arg5[%c0_14, %c0_15] : memref<256x128xf32, #tpu.memory_space<vmem>>, vector<256x128xf32>
    %c0_16 = arith.constant 0 : index
    %c0_17 = arith.constant 0 : index
    %34 = vector.load %arg7[%c0_16, %c0_17] : memref<256x128xf32, #tpu.memory_space<vmem>>, vector<256x128xf32>
    %35 = arith.mulf %32, %34 : vector<256x128xf32>
    %36 = arith.addf %33, %35 : vector<256x128xf32>
    %c0_18 = arith.constant 0 : index
    %c0_19 = arith.constant 0 : index
    %37 = vector.load %arg9[%c0_18, %c0_19] : memref<1x256xf32, #tpu.memory_space<vmem>>, vector<1x256xf32>
    %cst_20 = arith.constant 0.000000e+00 : f32
    %38 = vector.broadcast %cst_20 : f32 to vector<1x256xf32>
    %39 = arith.maximumf %37, %38 : vector<1x256xf32>
    %40 = math.absf %37 : vector<1x256xf32>
    %cst_21 = arith.constant 0.000000e+00 : f32
    %41 = vector.broadcast %cst_21 : f32 to vector<1x256xf32>
    %42 = arith.subf %41, %40 : vector<1x256xf32>
    %43 = math.exp %42 : vector<1x256xf32>
    %44 = math.log1p %43 : vector<1x256xf32>
    %45 = arith.addf %39, %44 : vector<1x256xf32>
    %c0_22 = arith.constant 0 : index
    %c0_23 = arith.constant 0 : index
    %46 = vector.load %arg8[%c0_22, %c0_23] : memref<1x256xf32, #tpu.memory_space<vmem>>, vector<1x256xf32>
    %c0_24 = arith.constant 0 : index
    %c0_25 = arith.constant 0 : index
    %47 = vector.load %arg10[%c0_24, %c0_25] : memref<1x256xf32, #tpu.memory_space<vmem>>, vector<1x256xf32>
    %48 = arith.mulf %45, %47 : vector<1x256xf32>
    %49 = arith.addf %46, %48 : vector<1x256xf32>
    %cst_26 = arith.constant dense<0.000000e+00> : vector<8x256xf32>
    %50 = tpu.matmul %23, %36, %cst_26 {dimension_numbers = #tpu.dot_dimension_numbers<[1], [1], [0], [0], [0, 0, 1, 0], [], []>} : vector<8x128xf32>, vector<256x128xf32>, vector<8x256xf32> -> vector<8x256xf32>
    %51 = vector.broadcast %49 : vector<1x256xf32> to vector<8x256xf32>
    %52 = arith.addf %50, %51 : vector<8x256xf32>
    %cst_27 = arith.constant 0.000000e+00 : f32
    %53 = vector.broadcast %cst_27 : f32 to vector<8x256xf32>
    %54 = arith.maximumf %52, %53 : vector<8x256xf32>
    %c0_28 = arith.constant 0 : index
    %c0_29 = arith.constant 0 : index
    %55 = vector.load %arg11[%c0_28, %c0_29] : memref<8x256xf32, #tpu.memory_space<vmem>>, vector<8x256xf32>
    tpu.vector_store %arg11[%c0_28, %c0_29], %54 {strides = array<i32>} : memref<8x256xf32, #tpu.memory_space<vmem>>, vector<8x256xf32>,
    %c256_i32 = arith.constant 256 : i32
    %56 = arith.muli %arg0, %c256_i32 : i32
    %57 = tpu.iota {dimensions = array<i32: 0>} : vector<256x128xi32>
    %58 = vector.broadcast %56 : i32 to vector<256x128xi32>
    %59 = arith.addi %58, %57 : vector<256x128xi32>
    %60 = tpu.iota {dimensions = array<i32: 1>} : vector<256x128xi32>
    %c384_i32 = arith.constant 384 : i32
    %61 = vector.broadcast %c384_i32 : i32 to vector<256x128xi32>
    %62 = arith.cmpi slt, %59, %61 : vector<256x128xi32>
    %c32_i32 = arith.constant 32 : i32
    %63 = vector.broadcast %c32_i32 : i32 to vector<256x128xi32>
    %64 = arith.cmpi slt, %60, %63 : vector<256x128xi32>
    %65 = arith.andi %62, %64 : vector<256x128xi1>
    %cst_30 = arith.constant 1.000000e+00 : f32
    %66 = vector.broadcast %cst_30 : f32 to vector<256x128xf32>
    %67 = arith.divf %66, %32 : vector<256x128xf32>
    %68 = math.log %32 : vector<256x128xf32>
    %cst_31 = arith.constant 2.000000e+00 : f32
    %69 = vector.broadcast %cst_31 : f32 to vector<256x128xf32>
    %70 = arith.mulf %69, %68 : vector<256x128xf32>
    %71 = arith.mulf %67, %67 : vector<256x128xf32>
    %72 = arith.addf %70, %71 : vector<256x128xf32>
    %c0_32 = arith.constant 0 : index
    %c0_33 = arith.constant 0 : index
    %73 = vector.load %arg5[%c0_32, %c0_33] : memref<256x128xf32, #tpu.memory_space<vmem>>, vector<256x128xf32>
    %c0_34 = arith.constant 0 : index
    %c0_35 = arith.constant 0 : index
    %74 = vector.load %arg5[%c0_34, %c0_35] : memref<256x128xf32, #tpu.memory_space<vmem>>, vector<256x128xf32>
    %75 = arith.mulf %73, %74 : vector<256x128xf32>
    %76 = arith.addf %72, %75 : vector<256x128xf32>
    %cst_36 = arith.constant 1.000000e+00 : f32
    %77 = vector.broadcast %cst_36 : f32 to vector<256x128xf32>
    %78 = arith.subf %76, %77 : vector<256x128xf32>
    %cst_37 = arith.constant 0.000000e+00 : f32
    %79 = vector.broadcast %cst_37 : f32 to vector<256x128xf32>
    %80 = arith.select %65, %78, %79 : vector<256x128xi1>, vector<256x128xf32>
    %81 = vector.shape_cast %80 : vector<256x128xf32> to vector<1x256x128xf32>
    %cst_38 = arith.constant dense<0.000000e+00> : vector<1xf32>
    %82 = vector.multi_reduction <add>, %81, %cst_38 [1, 2] : vector<1x256x128xf32> to vector<1xf32>
    %83 = vector.shape_cast %82 : vector<1xf32> to vector<1x1x1xf32>
    %84 = vector.extract %83[0, 0, 0] : f32 from vector<1x1x1xf32>
    %cst_39 = arith.constant 5.000000e-01 : f32
    %85 = arith.mulf %cst_39, %84 : f32
    %c256_i32_40 = arith.constant 256 : i32
    %86 = arith.muli %arg0, %c256_i32_40 : i32
    %87 = tpu.iota {dimensions = array<i32: 1>} : vector<1x256xi32>
    %88 = vector.broadcast %86 : i32 to vector<1x256xi32>
    %89 = arith.addi %88, %87 : vector<1x256xi32>
    %c384_i32_41 = arith.constant 384 : i32
    %90 = vector.broadcast %c384_i32_41 : i32 to vector<1x256xi32>
    %91 = arith.cmpi slt, %89, %90 : vector<1x256xi32>
    %cst_42 = arith.constant 1.000000e+00 : f32
    %92 = vector.broadcast %cst_42 : f32 to vector<1x256xf32>
    %93 = arith.divf %92, %45 : vector<1x256xf32>
    %94 = math.log %45 : vector<1x256xf32>
    %cst_43 = arith.constant 2.000000e+00 : f32
    %95 = vector.broadcast %cst_43 : f32 to vector<1x256xf32>
    %96 = arith.mulf %95, %94 : vector<1x256xf32>
    %97 = arith.mulf %93, %93 : vector<1x256xf32>
    %98 = arith.addf %96, %97 : vector<1x256xf32>
    %c0_44 = arith.constant 0 : index
    %c0_45 = arith.constant 0 : index
    %99 = vector.load %arg8[%c0_44, %c0_45] : memref<1x256xf32, #tpu.memory_space<vmem>>, vector<1x256xf32>
    %c0_46 = arith.constant 0 : index
    %c0_47 = arith.constant 0 : index
    %100 = vector.load %arg8[%c0_46, %c0_47] : memref<1x256xf32, #tpu.memory_space<vmem>>, vector<1x256xf32>
    %101 = arith.mulf %99, %100 : vector<1x256xf32>
    %102 = arith.addf %98, %101 : vector<1x256xf32>
    %cst_48 = arith.constant 1.000000e+00 : f32
    %103 = vector.broadcast %cst_48 : f32 to vector<1x256xf32>
    %104 = arith.subf %102, %103 : vector<1x256xf32>
    %cst_49 = arith.constant 0.000000e+00 : f32
    %105 = vector.broadcast %cst_49 : f32 to vector<1x256xf32>
    %106 = arith.select %91, %104, %105 : vector<1x256xi1>, vector<1x256xf32>
    %107 = vector.shape_cast %106 : vector<1x256xf32> to vector<1x1x256xf32>
    %cst_50 = arith.constant dense<0.000000e+00> : vector<1xf32>
    %108 = vector.multi_reduction <add>, %107, %cst_50 [1, 2] : vector<1x1x256xf32> to vector<1xf32>
    %109 = vector.shape_cast %108 : vector<1xf32> to vector<1x1x1xf32>
    %110 = vector.extract %109[0, 0, 0] : f32 from vector<1x1x1xf32>
    %cst_51 = arith.constant 5.000000e-01 : f32
    %111 = arith.mulf %cst_51, %110 : f32
    %112 = tpu.iota {dimensions = array<i32: 1>} : vector<1x128xi32>
    %c32_i32_52 = arith.constant 32 : i32
    %113 = vector.broadcast %c32_i32_52 : i32 to vector<1x128xi32>
    %114 = arith.cmpi slt, %112, %113 : vector<1x128xi32>
    %115 = arith.addf %8, %17 : vector<1x128xf32>
    %116 = math.log %8 : vector<1x128xf32>
    %117 = arith.subf %115, %116 : vector<1x128xf32>
    %118 = math.log %17 : vector<1x128xf32>
    %119 = arith.subf %117, %118 : vector<1x128xf32>
    %cst_53 = arith.constant 0.000000e+00 : f32
    %120 = vector.broadcast %cst_53 : f32 to vector<1x128xf32>
    %121 = arith.select %114, %119, %120 : vector<1x128xi1>, vector<1x128xf32>
    %122 = vector.shape_cast %121 : vector<1x128xf32> to vector<1x1x128xf32>
    %cst_54 = arith.constant dense<0.000000e+00> : vector<1xf32>
    %123 = vector.multi_reduction <add>, %122, %cst_54 [1, 2] : vector<1x1x128xf32> to vector<1xf32>
    %124 = vector.shape_cast %123 : vector<1xf32> to vector<1x1x1xf32>
    %125 = vector.extract %124[0, 0, 0] : f32 from vector<1x1x1xf32>
    %126 = arith.addf %85, %111 : f32
    %c0_i32 = arith.constant 0 : i32
    %127 = arith.cmpi eq, %arg0, %c0_i32 : i32
    %cst_55 = arith.constant 0.000000e+00 : f32
    %128 = arith.select %127, %125, %cst_55 : f32
    %129 = arith.addf %126, %128 : f32
    %130 = vector.broadcast %129 : f32 to vector<1x256xf32>
    %c0_56 = arith.constant 0 : index
    %c0_57 = arith.constant 0 : index
    %131 = vector.load %arg12[%c0_56, %c0_57] : memref<1x256xf32, #tpu.memory_space<vmem>>, vector<1x256xf32>
    tpu.vector_store %arg12[%c0_56, %c0_57], %130 {strides = array<i32>} : memref<1x256xf32, #tpu.memory_space<vmem>>, vector<1x256xf32>,
    return
  }
  func.func @transform_0(%arg0: i32) -> (i32, i32) {
    %c0_i32 = arith.constant 0 : i32
    %c0_i32_0 = arith.constant 0 : i32
    %c0_i32_1 = arith.constant 0 : i32
    return %c0_i32, %c0_i32_0 : i32, i32
  }
  func.func @transform_1(%arg0: i32) -> (i32, i32) {
    %c0_i32 = arith.constant 0 : i32
    %c0_i32_0 = arith.constant 0 : i32
    %c0_i32_1 = arith.constant 0 : i32
    return %c0_i32, %c0_i32_0 : i32, i32
  }
  func.func @transform_2(%arg0: i32) -> (i32, i32) {
    %c0_i32 = arith.constant 0 : i32
    %c0_i32_0 = arith.constant 0 : i32
    %c0_i32_1 = arith.constant 0 : i32
    return %c0_i32, %c0_i32_0 : i32, i32
  }
  func.func @transform_3(%arg0: i32) -> (i32, i32) {
    %c0_i32 = arith.constant 0 : i32
    %c0_i32_0 = arith.constant 0 : i32
    %c0_i32_1 = arith.constant 0 : i32
    return %c0_i32, %c0_i32_0 : i32, i32
  }
  func.func @transform_4(%arg0: i32) -> (i32, i32) {
    %c0_i32 = arith.constant 0 : i32
    %c0_i32_0 = arith.constant 0 : i32
    return %arg0, %c0_i32 : i32, i32
  }
  func.func @transform_5(%arg0: i32) -> (i32, i32) {
    %c0_i32 = arith.constant 0 : i32
    %c0_i32_0 = arith.constant 0 : i32
    return %arg0, %c0_i32 : i32, i32
  }
  func.func @transform_6(%arg0: i32) -> (i32, i32) {
    %c0_i32 = arith.constant 0 : i32
    %c0_i32_0 = arith.constant 0 : i32
    return %arg0, %c0_i32 : i32, i32
  }
  func.func @transform_7(%arg0: i32) -> (i32, i32) {
    %c0_i32 = arith.constant 0 : i32
    %c0_i32_0 = arith.constant 0 : i32
    return %c0_i32, %arg0 : i32, i32
  }
  func.func @transform_8(%arg0: i32) -> (i32, i32) {
    %c0_i32 = arith.constant 0 : i32
    %c0_i32_0 = arith.constant 0 : i32
    return %c0_i32, %arg0 : i32, i32
  }
  func.func @transform_9(%arg0: i32) -> (i32, i32) {
    %c0_i32 = arith.constant 0 : i32
    %c0_i32_0 = arith.constant 0 : i32
    return %c0_i32, %arg0 : i32, i32
  }
  func.func @transform_10(%arg0: i32) -> (i32, i32) {
    %c0_i32 = arith.constant 0 : i32
    %c0_i32_0 = arith.constant 0 : i32
    return %c0_i32, %arg0 : i32, i32
  }
  func.func @transform_11(%arg0: i32) -> (i32, i32) {
    %c0_i32 = arith.constant 0 : i32
    %c0_i32_0 = arith.constant 0 : i32
    return %c0_i32, %arg0 : i32, i32
  }
}

</mosaic_0001>

<bundles_post_ra>
// kernel: tpu_custom_call.1
= control target key start
LH: loop header
LB: loop body
LE: loop exit
PB: predicated region body
PF: predicated region fallthrough
CT: control target
= control target key end

     0   :  { %s4988_s0 = inlined_call_operand.hbm [shape: f32[8,128], index: 0, kind: input, shape index: {}]   ;;  %s4989_s1 = inlined_call_operand.hbm [shape: f32[8,128], index: 1, kind: input, shape index: {}]   ;;  %s4990_s2 = inlined_call_operand.hbm [shape: f32[1,128], index: 2, kind: input, shape index: {}]   ;;  %s4991_s3 = inlined_call_operand.hbm [shape: f32[1,128], index: 3, kind: input, shape index: {}]   ;;  %s4992_s4 = inlined_call_operand.hbm [shape: f32[512,128], index: 4, kind: input, shape index: {}]   ;;  %s4993_s5 = inlined_call_operand.hbm [shape: f32[512,128], index: 5, kind: input, shape index: {}]   ;;  %s4994_s6 = inlined_call_operand.hbm [shape: f32[512,128], index: 6, kind: input, shape index: {}]   ;;  %s4995_s7 = inlined_call_operand.vmem [shape: f32[1,512], index: 7, kind: input, shape index: {}]   ;;  %s4996_s8 = inlined_call_operand.vmem [shape: f32[1,512], index: 8, kind: input, shape index: {}]   ;;  %s4997_s9 = inlined_call_operand.vmem [shape: f32[1,512], index: 9, kind: input, shape index: {}]   ;;  %s4998_s10 = inlined_call_operand.hbm [shape: f32[8,512], index: 10, kind: output, shape index: {0}]   ;;  %s4999_s11 = inlined_call_operand.hbm [shape: f32[1,512], index: 11, kind: output, shape index: {1}]  }
   0x1   :  { %5037 = sst [smem:[#allocation57_spill]] %s4988_s0 }
   0x2   :  { %5038 = sst [smem:[#allocation58_spill]] %s4992_s4 }
   0x3   :  { %5039 = sst [smem:[#allocation59_spill]] %s4998_s10 }
   0x4   :  { %5040 = sst [smem:[#allocation60_spill]] %s4999_s11 }
   0x5   :  { %17 = vsyncpa [#allocation3], 0 }
   0x6   :  { %18 = vsyncpa [#allocation6], 0 }
   0x7   :  { %19 = vsyncpa [#allocation9], 0 }
   0x8   :  { %20 = vsyncpa [#allocation4], 0 }
   0x9   :  { %22 = vsyncpa [#allocation4 + $0x1], 0 }
   0xa   :  { %23 = vsyncpa [#allocation15], 0 }
   0xb   :  { %25 = vsyncpa [#allocation15 + $0x1], 0  ;;  %s3123_s17 = smov 0   ;;  %s3125_s18 = smov 0  }
   0xc   :  { %s3127_s19 = smov 0   ;;  %s3129_s20 = smov 0  }
   0xd LB: > { %5041 = sst [smem:[#allocation22_spill]] %s3038_s17  ;;  %s3144_s21 = sadd.s32 4294967295, %s3050_s20   ;;  %s3050_s20 = sphi %s3129_s20, %s5287_s20   ;;  %s3046_s19 = sphi %s3127_s19, %s5289_s19   ;;  %s3042_s18 = sphi %s3125_s18, %s5291_s18   ;;  %s3038_s17 = sphi %s3123_s17, %s5290_s17  }
   0xe   : > { %5042 = sst [smem:[#allocation23_spill]] %s3046_s19  ;;  %s2260_s22 = sadd.s32 4294967294, %s3050_s20  }
   0xf   : > { %5043 = sst [smem:[#allocation24_spill]] %s3050_s20  ;;  %p135_p0 = scmp.ne.s32.totalorder %s3042_s18, %s3038_s17 }
  0x10   : > { %p5000_p1 = scmp.eq.s32.totalorder %s3144_s21, 0  ;;  %p295_p3 = scmp.eq.s32.totalorder %s2260_s22, 1 }
  0x11   : > { %p2261_p5 = scmp.ge.s32.totalorder %s3050_s20, 1  ;;  %p328_p7 = scmp.lt.s32.totalorder %s3050_s20, 3 }
  0x12   : > { %p3153_p4 = por %p5000_p1, %p135_p0  ;;  %p3158_p6 = por %p295_p3, %p135_p0 }
  0x13   : > { %p3163_p8 = pnand %p2261_p5, %p328_p7  ;;  %s3052_s26 = smov [#allocation2]  }
  0x14   : > { %s5044_s23 = scalar_select %p3153_p4, 1, 0 }
  0x15   : > { %s5045_s24 = scalar_select %p3158_p6, 1, 0 }
  0x16   : > { %s5047_s25 = scalar_select %p3163_p8, 1, 0 }
  0x17   : > { %5046 = sst [smem:[#allocation25_spill]] %s5045_s24  ;;  %s341_s27 = sshll.u32 %s3052_s26, 4  ;;  %s342_s27 = int_to_ptr.vmem [resolvable:$true] %s341_s27 }
  0x18   : > { %p2402_p10 = pneg %p3163_p8  ;;  %s3171_s28 = sadd.s32 1, %s3050_s20  }
  0x19   : > { %5048 = sst [smem:[#allocation26_spill]] %s3171_s28  ;;  %s119_s30 = ssub.s32 %s3050_s20, %s3171_s28 }
  0x1a   : > { %p3175_p11 = pnand %p2402_p10, %p5000_p1  ;;  %p3181_p12 = scmp.eq.s32.totalorder %s119_s30, 0 }
  0x1b   : > { %s122_s13 = sadd.s32 1, %s3046_s19  ;;  %p129_p13 = scmp.ne.s32.totalorder %s3046_s19, %s3042_s18 }
  0x1c   : > { %s5049_s29 = scalar_select %p3175_p11, 1, 0 }
  0x1d   : > { %p5007_p0 = pneg %p3175_p11  ;;  %s2767_s14 = scalar_lea.vmem %s342_s27, 128 }
  0x1e   : > { %p2768_p3 = scmp.ne.s32.totalorder %s342_s27, %s2767_s14  ;;  %p2775_p10 = scmp.lt.s32.totalorder %s342_s27, %s342_s27 }
  0x1f   : > { %p2776_p9 = scmp.lt.s32.totalorder %s2767_s14, %s2767_s14 }
  0x20   : > { %p2770_p5 = pnand %p2768_p3, %p5007_p0 }
  0x21   : > { %p2777_p1 = por %p2776_p9, %p2775_p10 }
  0x22   : > { %p2771_p7 = pneg %p2770_p5 }
  0x24   : > { %p2778_p2 = pnand %p2777_p1, %p2771_p7 }
  0x26   : > { %2781 = shalt.err (!%p2778_p2)
}
  0x27   : > { %s5051_s0 = sld [smem:[#allocation57_spill]]  ;;  %p130_p1 = scmp.eq.s32.totalorder %s3050_s20, 0 }
  0x28   : > { %s3201_s22 = scalar_select %p3181_p12, %s3046_s19, %s122_s13  }
  0x29   : > { %p5053_p2 = scmp.eq.s32.totalorder %s3144_s21, 1  ;;  %p2436_p3 = scmp.lt.s32.totalorder %s3050_s20, 2 }
  0x2a   : > { %5052 = sst [smem:[#allocation27_spill]] %s3201_s22  ;;  %s385_s30 = sand.u32 1, %s3050_s20  }
  0x2b   : > { %p3209_p9 = por %p5053_p2, %p129_p13  ;;  %p131_p5 = por %p130_p1, %p129_p13 }
  0x2c   : > { %s387_s14 = sand.u32 1, %s3046_s19   ;;  %s3220_s15 = sshll.u32 %s3050_s20, 12 }
  0x2d   : > { %2405 = dma.hbm_to_vmem [thread:$0]  (!%p3175_p11), %s5051_s0, 128, %s342_s27, [#allocation3]  }
  0x2e   : > { %s5054_s26 = scalar_select %p3209_p9, 1, 0 }
  0x2f   : > { %s3222_s16 = sshll.u32 %s387_s14, 8  ;;  %s5055_s4 = sld [smem:[#allocation58_spill]] }
  0x30   : > { %p3230_p12 = pnand %p2436_p3, %p131_p5  ;;  %s389_s22 = scalar_lea.vmem [#allocation10], %s3222_s16 }
  0x31   : > { %s396_s19 = sshll.u32 %s389_s22, 4  ;;  %s3237_s14 = scalar_lea.sflag [#allocation3], %s385_s30  ;;  %s3235_s19 = int_to_ptr.vmem [resolvable:$true] %s396_s19 }
  0x32   : > { %p3243_p7 = pneg %p3230_p12 }
  0x35   : > { %s3228_s13 = scalar_lea.hbm %s5055_s4, %s3220_s15  ;;  %s2787_s24 = scalar_lea.hbm %s5055_s4, 8192 }
  0x36   : > { %s2782_s28 = scalar_lea.hbm %s3228_s13, 4096  ;;  %p2788_p2 = scmp.lt.s32.totalorder %s3228_s13, %s5055_s4 }
  0x37   : > { %p2783_p13 = scmp.ne.s32.totalorder %s3228_s13, %s2782_s28  ;;  %p2789_p3 = scmp.lt.s32.totalorder %s2787_s24, %s2782_s28 }
  0x39   : > { %p2785_p10 = pnand %p3243_p7, %p2783_p13  ;;  %p2790_p5 = por %p2789_p3, %p2788_p2 }
  0x3b   : > { %p2786_p1 = pneg %p2785_p10 }
  0x3d   : > { %p2791_p0 = pnand %p2790_p5, %p2786_p1 }
  0x3f   : > { %2794 = shalt.err (!%p2791_p0)
}
  0x40   : > { %s2795_s30 = scalar_lea.vmem %s3235_s19, 4096  ;;  %s3053_s11 = smov [#allocation10]  }
  0x41   : > { %p2796_p6 = scmp.ne.s32.totalorder %s3235_s19, %s2795_s30  ;;  %s2800_s20 = sshll.u32 %s3053_s11, 4  ;;  %s2801_s20 = int_to_ptr.vmem [resolvable:$false] %s2800_s20 }
  0x42   : > { %s2802_s12 = scalar_lea.vmem %s2801_s20, 8192  ;;  %p2803_p9 = scmp.lt.s32.totalorder %s3235_s19, %s2801_s20 }
  0x43   : > { %p2798_p13 = pnand %p2796_p6, %p3243_p7  ;;  %p2804_p4 = scmp.lt.s32.totalorder %s2802_s12, %s2795_s30 }
  0x45   : > { %p2799_p10 = pneg %p2798_p13  ;;  %p2805_p8 = por %p2804_p4, %p2803_p9 }
  0x47   : > { %p2806_p11 = pnand %p2805_p8, %p2799_p10 }
  0x49   : > { %2809 = shalt.err (!%p2806_p11)
}
  0x4a   : > { %s5014_s17 = smov 128   ;;  %s5016_s24 = smov 8  }
  0x4b   : > { %2418 = dma.hbm_to_vmem [thread:$0]  (!%p3230_p12), %s3228_s13, 4096, %s3235_s19, %s3237_s14, %s5014_s17, %s5014_s17, %s5016_s24  }
  0x4c   : > { %s3056_s11 = smov [#allocation5]   ;;  %s3273_s20 = scalar_lea.hbm %s4993_s5, %s3220_s15 }
  0x4d   : > { %s352_s28 = sshll.u32 %s3056_s11, 4  ;;  %p5058_p6 = scmp.ne.s32.totalorder %s5049_s29, 0  ;;  %s353_s28 = int_to_ptr.vmem [resolvable:$true] %s352_s28 }
  0x4e   : > { %s2821_s12 = scalar_lea.vmem %s353_s28, 128  ;;  %p2829_p9 = scmp.lt.s32.totalorder %s353_s28, %s353_s28 }
  0x4f   : > { %p2822_p4 = scmp.ne.s32.totalorder %s353_s28, %s2821_s12  ;;  %p5059_p8 = pneg %p5058_p6 }
  0x50   : > { %p2830_p1 = scmp.lt.s32.totalorder %s2821_s12, %s2821_s12 }
  0x51   : > { %p2824_p11 = pnand %p2822_p4, %p5059_p8 }
  0x52   : > { %p2831_p2 = por %p2830_p1, %p2829_p9 }
  0x53   : > { %p2825_p0 = pneg %p2824_p11 }
  0x55   : > { %p2832_p3 = pnand %p2831_p2, %p2825_p0 }
  0x57   : > { %2835 = shalt.err (!%p2832_p3)
}
  0x58   : > { %2408 = dma.hbm_to_vmem [thread:$0]  (!%p5058_p6), %s4989_s1, 128, %s353_s28, [#allocation6]  }
  0x59   : > { %s410_s11 = scalar_lea.vmem [#allocation11], %s3222_s16  ;;  %s3057_s30 = smov [#allocation7]  }
  0x5a   : > { %s417_s22 = sshll.u32 %s410_s11, 4  ;;  %s3286_s12 = sshll.u32 %s3057_s30, 4  ;;  %s3284_s22 = int_to_ptr.vmem [resolvable:$true] %s417_s22  ;;  %s364_s12 = int_to_ptr.vmem [resolvable:$true] %s3286_s12 }
  0x5b   : > { %s2836_s17 = scalar_lea.hbm %s3273_s20, 4096  ;;  %s2841_s13 = scalar_lea.hbm %s4993_s5, 8192 }
  0x5c   : > { %p2837_p5 = scmp.ne.s32.totalorder %s3273_s20, %s2836_s17  ;;  %p2842_p4 = scmp.lt.s32.totalorder %s3273_s20, %s4993_s5 }
  0x5d   : > { %p2843_p8 = scmp.lt.s32.totalorder %s2841_s13, %s2836_s17 }
  0x5e   : > { %p2839_p13 = pnand %p2837_p5, %p3243_p7 }
  0x5f   : > { %p2844_p11 = por %p2843_p8, %p2842_p4 }
  0x60   : > { %p2840_p10 = pneg %p2839_p13 }
  0x62   : > { %p2845_p0 = pnand %p2844_p11, %p2840_p10 }
  0x64   : > { %2848 = shalt.err (!%p2845_p0)
}
  0x65   : > { %s2849_s28 = scalar_lea.vmem %s3284_s22, 4096  ;;  %s3058_s11 = smov [#allocation11]  }
  0x66   : > { %p2850_p9 = scmp.ne.s32.totalorder %s3284_s22, %s2849_s28  ;;  %s2854_s24 = sshll.u32 %s3058_s11, 4  ;;  %s2855_s24 = int_to_ptr.vmem [resolvable:$false] %s2854_s24 }
  0x67   : > { %s2856_s30 = scalar_lea.vmem %s2855_s24, 8192  ;;  %p2857_p3 = scmp.lt.s32.totalorder %s3284_s22, %s2855_s24 }
  0x68   : > { %p2852_p1 = pnand %p2850_p9, %p3243_p7  ;;  %p2858_p5 = scmp.lt.s32.totalorder %s2856_s30, %s2849_s28 }
  0x6a   : > { %p2853_p2 = pneg %p2852_p1  ;;  %p2859_p13 = por %p2858_p5, %p2857_p3 }
  0x6c   : > { %p2860_p6 = pnand %p2859_p13, %p2853_p2 }
  0x6e   : > { %2863 = shalt.err (!%p2860_p6)
}
  0x6f   : > { %s5060_s4 = smov 8   ;;  %s5061_s10 = smov 128  }
  0x70   : > { %2421 = dma.hbm_to_vmem [thread:$0]  (!%p3230_p12), %s3273_s20, 4096, %s3284_s22, %s3237_s14, %s5061_s10, %s5061_s10, %s5060_s4  }
  0x71   : > { %s2875_s17 = scalar_lea.vmem %s364_s12, 16  ;;  %p5062_p4 = scmp.ne.s32.totalorder %s5049_s29, 0 }
  0x72   : > { %p2876_p10 = scmp.ne.s32.totalorder %s364_s12, %s2875_s17  ;;  %s2882_s19 = scalar_lea.vmem %s364_s12, 32 }
  0x73   : > { %p5063_p8 = pneg %p5062_p4  ;;  %p2883_p6 = scmp.lt.s32.totalorder %s364_s12, %s364_s12 }
  0x74   : > { %p2884_p9 = scmp.lt.s32.totalorder %s2882_s19, %s2875_s17 }
  0x75   : > { %p2878_p11 = pnand %p2876_p10, %p5063_p8 }
  0x76   : > { %p2885_p1 = por %p2884_p9, %p2883_p6 }
  0x77   : > { %p2879_p0 = pneg %p2878_p11 }
  0x79   : > { %p2886_p2 = pnand %p2885_p1, %p2879_p0 }
  0x7b   : > { %2889 = shalt.err (!%p2886_p2)
}
  0x7c   : > { %2411 = dma.hbm_to_vmem [thread:$0]  (!%p5062_p4), %s4990_s2, 16, %s364_s12, [#allocation6]  }
  0x7d   : > { %s3059_s20 = smov [#allocation8]   ;;  %s3325_s30 = scalar_lea.hbm %s4994_s6, %s3220_s15 }
  0x7e   : > { %s374_s22 = sshll.u32 %s3059_s20, 4  ;;  %p5064_p5 = pmov %p5063_p8  ;;  %s375_s22 = int_to_ptr.vmem [resolvable:$true] %s374_s22 }
  0x7f   : > { %s2901_s17 = scalar_lea.vmem %s375_s22, 16  ;;  %s2908_s19 = scalar_lea.vmem %s375_s22, 32 }
  0x80   : > { %p2902_p3 = scmp.ne.s32.totalorder %s375_s22, %s2901_s17  ;;  %p2909_p8 = scmp.lt.s32.totalorder %s375_s22, %s375_s22 }
  0x81   : > { %p2910_p11 = scmp.lt.s32.totalorder %s2908_s19, %s2901_s17 }
  0x82   : > { %p2904_p13 = pnand %p2902_p3, %p5064_p5 }
  0x83   : > { %p2911_p0 = por %p2910_p11, %p2909_p8 }
  0x84   : > { %p2905_p10 = pneg %p2904_p13 }
  0x86   : > { %p2912_p6 = pnand %p2911_p0, %p2905_p10 }
  0x88   : > { %2915 = shalt.err (!%p2912_p6)
}
  0x89   : > { %2414 = dma.hbm_to_vmem [thread:$0]  (!%p5062_p4), %s4991_s3, 16, %s375_s22, [#allocation9]  }
  0x8a   : > { %s431_s15 = scalar_lea.vmem [#allocation12], %s3222_s16  ;;  %s2916_s20 = scalar_lea.hbm %s3325_s30, 4096 }
  0x8b   : > { %s438_s28 = sshll.u32 %s431_s15, 4  ;;  %p2917_p9 = scmp.ne.s32.totalorder %s3325_s30, %s2916_s20  ;;  %s439_s28 = int_to_ptr.vmem [resolvable:$true] %s438_s28 }
  0x8c   : > { %s2921_s29 = scalar_lea.hbm %s4994_s6, 8192  ;;  %p2922_p3 = scmp.lt.s32.totalorder %s3325_s30, %s4994_s6 }
  0x8d   : > { %p2919_p1 = pnand %p2917_p9, %p3243_p7  ;;  %p2923_p5 = scmp.lt.s32.totalorder %s2921_s29, %s2916_s20 }
  0x8f   : > { %p2920_p2 = pneg %p2919_p1  ;;  %p2924_p13 = por %p2923_p5, %p2922_p3 }
  0x91   : > { %p2925_p10 = pnand %p2924_p13, %p2920_p2 }
  0x93   : > { %2928 = shalt.err (!%p2925_p10)
}
  0x94   : > { %s2929_s16 = scalar_lea.vmem %s439_s28, 4096  ;;  %s3060_s22 = smov [#allocation12]  }
  0x95   : > { %p2930_p4 = scmp.ne.s32.totalorder %s439_s28, %s2929_s16  ;;  %s2934_s12 = sshll.u32 %s3060_s22, 4  ;;  %s2935_s12 = int_to_ptr.vmem [resolvable:$false] %s2934_s12 }
  0x96   : > { %s2936_s13 = scalar_lea.vmem %s2935_s12, 8192  ;;  %p2937_p0 = scmp.lt.s32.totalorder %s439_s28, %s2935_s12 }
  0x97   : > { %p2932_p8 = pnand %p2930_p4, %p3243_p7  ;;  %p2938_p6 = scmp.lt.s32.totalorder %s2936_s13, %s2929_s16 }
  0x99   : > { %p2933_p11 = pneg %p2932_p8  ;;  %p2939_p9 = por %p2938_p6, %p2937_p0 }
  0x9b   : > { %p2940_p1 = pnand %p2939_p9, %p2933_p11 }
  0x9d   : > { %2943 = shalt.err (!%p2940_p1)
}
  0x9e   : > { %2424 = dma.hbm_to_vmem [thread:$0]  (!%p3230_p12), %s3325_s30, 4096, %s439_s28, %s3237_s14, %s5061_s10, %s5061_s10, %s5060_s4  }
  0x9f   : > { %p5065_p7 = scmp.ne.s32.totalorder %s5047_s25, 0 }
  0xa1   : > { %474 = sbr.rel (%p5065_p7) target bundleno = 717 (0x2cd), region = 60 }
  0xa6   : > { %p5066_p2 = scmp.eq.s32.totalorder %s3144_s21, 0 }
  0xa8   : > { %3013 = dma.done.wait (%p5066_p2), [#allocation3], 128   ;;  %p5067_p3 = pmov %p5066_p2 }
  0xa9   : > { %p5068_p5 = pmov %p5066_p2 }
  0xaa   : > { %3015 = vsyncadd (%p5067_p3), [#allocation3], 4294967168 }
  0xab   : > { %3017 = dma.done.wait (%p5068_p5), [#allocation6], 144   ;;  %p5069_p13 = pmov %p5066_p2 }
  0xac   : > { %p5070_p10 = pmov %p5066_p2 }
  0xad   : > { %3019 = vsyncadd (%p5069_p13), [#allocation6], 4294967152 }
  0xae   : > { %3021 = dma.done.wait (%p5070_p10), [#allocation9], 16   ;;  %p5071_p12 = pmov %p5066_p2 }
  0xaf   : > { %s492_s0 = sand.u32 1, %s3144_s21   ;;  %s3372_s25 = sand.u32 1, %s3042_s18  }
  0xb0   : > { %3023 = vsyncadd (%p5071_p12), [#allocation9], 4294967280  ;;  %s3375_s14 = sshll.u32 %s3372_s25, 8  ;;  %s493_s27 = scalar_lea.sflag [#allocation3], %s492_s0 }
  0xb1   : > { %s3378_s4 = scalar_lea.vmem [#allocation10], %s3375_s14  ;;  %p5072_p4 = scmp.ne.s32.totalorder %s5044_s23, 0 }
  0xb3   : > { %3025 = dma.done.wait (%p5072_p4), %s493_s27, 12288  }
  0xb4   : > { %3027 = vsyncadd (%p5072_p4), %s493_s27, 4294955008  ;;  %s3385_s10 = scalar_lea.vmem [#allocation11], %s3375_s14  ;;  %s3500_s23 = scalar_lea.vmem [#allocation12], %s3375_s14 }
  0xb5   : > { %v3388_v0 = vld [vmem:[%s3385_s10 + $0xf8] sm:$0xff]  ;;  %v3396_v4 = vld [vmem:[%s3385_s10 + $0xf0] sm:$0xff]  ;;  %v3404_v12 = vld [vmem:[%s3385_s10 + $0xe8] sm:$0xff]  ;;  %s2289_s30 = sshll.u32 %s3144_s21, 8  ;;  %s2286_s15 = sshll.u32 %s3144_s21, 1 }
  0xb6   : > { %v738_v1 = vand.u32 2147483647, %v3388_v0  ;;  %v3392_v2 = vld [vmem:[%s3385_s10 + $0x78] sm:$0xff]  ;;  %v737_v6 = vand.u32 2147483647, %v3396_v4  ;;  %v3400_v7 = vld [vmem:[%s3385_s10 + $0x70] sm:$0xff] }
  0xb7   : > { %v722_v3 = vand.u32 2147483647, %v3392_v2  ;;  %v721_v9 = vand.u32 2147483647, %v3400_v7  ;;  %v736_v15 = vand.u32 2147483647, %v3404_v12 }
  0xb8   : > { %v770_v5 = vsub.f32 0.0, %v738_v1  ;;  %v769_v11 = vsub.f32 0.0, %v737_v6  ;;  %v3408_v17 = vld [vmem:[%s3385_s10 + $0x68] sm:$0xff]  ;;  %v3411_v20 = vld [vmem:[%s3385_s10 + $0xe0] sm:$0xff]  ;;  %v3420_v27 = vld [vmem:[%s3385_s10 + $0xd8] sm:$0xff]  ;;  %v706_v43 = vmax.f32 %v3388_v0, 0.0 }
  0xb9   : > { %v754_v8 = vsub.f32 0.0, %v722_v3  ;;  %v753_v14 = vsub.f32 0.0, %v721_v9  ;;  %v768_v19 = vsub.f32 0.0, %v736_v15  ;;  %v720_v21 = vand.u32 2147483647, %v3408_v17  ;;  %v3415_v22 = vld [vmem:[%s3385_s10 + $0x60] sm:$0xff] }
  0xba   : > { %v833_v10 = vmul.f32 1.442695, %v770_v5  ;;  %v831_v16 = vmul.f32 1.442695, %v769_v11  ;;  %v735_v24 = vand.u32 2147483647, %v3411_v20 }
  0xbb   : > { %v801_v13 = vmul.f32 1.442695, %v754_v8  ;;  %v799_v18 = vmul.f32 1.442695, %v753_v14  ;;  %v829_v23 = vmul.f32 1.442695, %v768_v19 }
  0xbc   : > { %2480 = vpow2.f32 %v833_v10  ;;  %v752_v25 = vsub.f32 0.0, %v720_v21  ;;  %v719_v26 = vand.u32 2147483647, %v3415_v22  ;;  %v767_v28 = vsub.f32 0.0, %v735_v24  ;;  %v3424_v32 = vld [vmem:[%s3385_s10 + $0x58] sm:$0xff]  ;;  %v3428_v37 = vld [vmem:[%s3385_s10 + $0xd0] sm:$0xff] }
  0xbd   : > { %2482 = vpow2.f32 %v801_v13  ;;  %v734_v29 = vand.u32 2147483647, %v3420_v27  ;;  %v718_v35 = vand.u32 2147483647, %v3424_v32  ;;  %v3431_v40 = vld [vmem:[%s3385_s10 + $0x50] sm:$0xff]  ;;  %v690_v46 = vmax.f32 %v3392_v2, 0.0 }
  0xbe   : > { %2484 = vpow2.f32 %v831_v16  ;;  %v797_v30 = vmul.f32 1.442695, %v752_v25  ;;  %v751_v31 = vsub.f32 0.0, %v719_v26  ;;  %v827_v33 = vmul.f32 1.442695, %v767_v28  ;;  %v3443_v59 = vld [vmem:[%s3385_s10 + $0xc8] sm:$0xff] }
  0xbf   : > { %2486 = vpow2.f32 %v799_v18  ;;  %v766_v34 = vsub.f32 0.0, %v734_v29  ;;  %v750_v39 = vsub.f32 0.0, %v718_v35  ;;  %v733_v42 = vand.u32 2147483647, %v3428_v37  ;;  %v3447_v1 = vld [vmem:[%s3385_s10 + $0x48] sm:$0xff]  ;;  %v1182_v2 = vld [vmem:[%s3378_s4 + $0xd8] sm:$0xff] }
  0xc0   : > { %2488 = vpow2.f32 %v829_v23  ;;  %v795_v36 = vmul.f32 1.442695, %v751_v31  ;;  %v717_v44 = vand.u32 2147483647, %v3431_v40  ;;  %v705_v47 = vmax.f32 %v3396_v4, 0.0  ;;  %p4510_p8 = scmp.lt.s32.totalorder %s2286_s15, 3 }
  0xc1   : > { %2490 = vpow2.f32 %v797_v30  ;;  %v825_v38 = vmul.f32 1.442695, %v766_v34  ;;  %v793_v41 = vmul.f32 1.442695, %v750_v39  ;;  %v689_v48 = vmax.f32 %v3400_v7, 0.0  ;;  %v1217_v30 = vld [vmem:[%s3500_s23 + $0xf0] sm:$0xff] }
  0xc2   : > { %2492 = vpow2.f32 %v827_v33  ;;  %v704_v51 = vmax.f32 %v3404_v12, 0.0  ;;  %v688_v52 = vmax.f32 %v3408_v17, 0.0  ;;  %v703_v53 = vmax.f32 %v3411_v20, 0.0  ;;  %s5293_s15 = smov (!%p4510_p8, %s2286_s15), 3  ;;  %s2284_s13 = sshll.u32 %s3372_s25, 4 }
  0xc3   : > { %2494 = vpow2.f32 %v795_v36  ;;  %v765_v58 = vsub.f32 0.0, %v733_v42  ;;  %v687_v62 = vmax.f32 %v3415_v22, 0.0  ;;  %v749_v63 = vsub.f32 0.0, %v717_v44  ;;  %s591_s24 = scalar_lea.vmem %s4996_s8, %s5293_s15  ;;  %s4903_s19 = scalar_lea.vmem %s4995_s7, %s5293_s15 }
  0xc4   : > { %2496 = vpow2.f32 %v825_v38  ;;  %v702_v6 = vmax.f32 %v3420_v27, 0.0  ;;  %v732_v11 = vand.u32 2147483647, %v3443_v59  ;;  %v716_v16 = vand.u32 2147483647, %v3447_v1  ;;  %s596_s12 = scalar_lea.vmem %s4997_s9, %s5293_s15  ;;  %s572_s0 = scalar_lea.vmem [#allocation13], %s2284_s13 }
  0xc5   : > { %2498 = vpow2.f32 %v793_v41  ;;  %v3451_v15 = vmul.f32 1.442695, %v765_v58  ;;  %v3454_v21 = vmul.f32 1.442695, %v749_v63  ;;  %v686_v28 = vmax.f32 %v3424_v32, 0.0  ;;  %s2039_s14 = sshll.u32 %s572_s0, 4  ;;  %s2040_s14 = int_to_ptr.vmem [resolvable:$true] %s2039_s14 }
  0xc6   : > { %s2020_s15 = scalar_lea.sflag [#allocation4], %s3372_s25  ;;  %s2944_s28 = scalar_lea.vmem %s2040_s14, 256 }
  0xc7   : > { %p2945_p11 = scmp.ne.s32.totalorder %s2040_s14, %s2944_s28  ;;  %p5278_p0 = scmp.ne.s32.totalorder %s5054_s26, 0 }
  0xc8   : > { %s3061_s20 = smov [#allocation13]  }
  0xc9   : > { %v2481_v45 = vpop.eup %2480  ;;  %p2946_p6 = pnand %p2945_p11, %p5278_p0  ;;  %s2948_s11 = sshll.u32 %s3061_s20, 4  ;;  %s2949_s11 = int_to_ptr.vmem [resolvable:$false] %s2948_s11 }
  0xca   : > { %v2483_v49 = vpop.eup %2482  ;;  %v1114_v50 = vadd.f32 1.0, %v2481_v45  ;;  %v1117_v55 = vmul.f32 -0.5, %v2481_v45  ;;  %v1120_v3 = vand.u32 2147483647, %v2481_v45  ;;  %p2951_p1 = scmp.lt.s32.totalorder %s2040_s14, %s2949_s11 }
  0xcb   : > { %v2485_v54 = vpop.eup %2484  ;;  %v970_v56 = vadd.f32 1.0, %v2483_v49  ;;  %v973_v57 = vmul.f32 -0.5, %v2483_v49  ;;  %v976_v9 = vand.u32 2147483647, %v2483_v49  ;;  %p2947_p9 = pneg %p2946_p6 }
  0xcc   : > { %v2487_v60 = vpop.eup %2486  ;;  %2500 = vlog2.f32 %v1114_v50  ;;  %v1105_v61 = vadd.f32 1.0, %v2485_v54  ;;  %v1108_v5 = vmul.f32 -0.5, %v2485_v54  ;;  %v1118_v13 = vadd.f32 1.0, %v1117_v55 }
  0xcd   : > { %2502 = vlog2.f32 %v970_v56  ;;  %v2489_v8 = vpop.eup %2488  ;;  %v961_v10 = vadd.f32 1.0, %v2487_v60  ;;  %v974_v14 = vadd.f32 1.0, %v973_v57  ;;  %v964_v18 = vmul.f32 -0.5, %v2487_v60  ;;  %v1201_v57 = vld [vmem:[%s3500_s23 + $0x70] sm:$0xff] }
  0xce   : > { %2504 = vlog2.f32 %v1105_v61  ;;  %v1096_v19 = vadd.f32 1.0, %v2489_v8  ;;  %v2491_v23 = vpop.eup %2490  ;;  %vm3456_vm0 = vcmp.lt.f32.partialorder %v1120_v3, 0.0004427343  ;;  %v1109_v25 = vadd.f32 1.0, %v1108_v5 }
  0xcf   : > { %2506 = vlog2.f32 %v961_v10  ;;  %v1111_v26 = vand.u32 2147483647, %v2485_v54  ;;  %v2493_v29 = vpop.eup %2492  ;;  %vm3461_vm1 = vcmp.lt.f32.partialorder %v976_v9, 0.0004427343  ;;  %v1099_v31 = vmul.f32 -0.5, %v2489_v8 }
  0xd0   : > { %2508 = vlog2.f32 %v1096_v19  ;;  %v952_v33 = vadd.f32 1.0, %v2491_v23  ;;  %v955_v34 = vmul.f32 -0.5, %v2491_v23  ;;  %v2495_v35 = vpop.eup %2494  ;;  %v1119_v36 = vmul.f32 %v2481_v45, %v1118_v13 }
  0xd1   : > { %v975_v38 = vmul.f32 %v2483_v49, %v974_v14  ;;  %v967_v39 = vand.u32 2147483647, %v2487_v60  ;;  %v1087_v41 = vadd.f32 1.0, %v2493_v29  ;;  %v3465_v42 = vpop.eup %2496  ;;  %v965_v44 = vadd.f32 1.0, %v964_v18 }
  0xd2   : > { %v1102_v50 = vand.u32 2147483647, %v2489_v8  ;;  %2510 = vlog2.f32 %v952_v33  ;;  %v1090_v55 = vmul.f32 -0.5, %v2493_v29  ;;  %v1110_v56 = vmul.f32 %v2485_v54, %v1109_v25  ;;  %v3471_v61 = vpop.eup %2498  ;;  %v1216_v54 = vld [vmem:[%s3500_s23 + $0xe8] sm:$0xff] }
  0xd3   : > { %vm3467_vm2 = vcmp.lt.f32.partialorder %v1111_v26, 0.0004427343  ;;  %2512 = vlog2.f32 %v1087_v41  ;;  %v943_v58 = vadd.f32 1.0, %v2495_v35  ;;  %v1100_v63 = vadd.f32 1.0, %v1099_v31  ;;  %v1215_v41 = vld [vmem:[%s3500_s23 + $0xe0] sm:$0xff] }
  0xd4   : > { %v956_v45 = vadd.f32 1.0, %v955_v34  ;;  %v958_v49 = vand.u32 2147483647, %v2491_v23  ;;  %v946_v3 = vmul.f32 -0.5, %v2495_v35  ;;  %v1091_v5 = vadd.f32 1.0, %v1090_v55 }
  0xd5   : > { %v1093_v9 = vand.u32 2147483647, %v2493_v29  ;;  %2514 = vlog2.f32 %v943_v58  ;;  %v1078_v10 = vadd.f32 1.0, %v3465_v42  ;;  %v966_v13 = vmul.f32 %v2487_v60, %v965_v44  ;;  %v1199_v58 = vld [vmem:[%s3500_s23 + $0x60] sm:$0xff] }
  0xd6   : > { %vm3474_vm3 = vcmp.lt.f32.partialorder %v967_v39, 0.0004427343  ;;  %vm3478_vm4 = vcmp.lt.f32.partialorder %v1102_v50, 0.0004427343  ;;  %v1081_v18 = vmul.f32 -0.5, %v3465_v42  ;;  %v947_v25 = vadd.f32 1.0, %v946_v3 }
  0xd7   : > { %v949_v26 = vand.u32 2147483647, %v2495_v35  ;;  %2516 = vlog2.f32 %v1078_v10  ;;  %v934_v31 = vadd.f32 1.0, %v3471_v61  ;;  %v1101_v60 = vmul.f32 %v2489_v8, %v1100_v63  ;;  %v1214_v10 = vld [vmem:[%s3500_s23 + $0xd8] sm:$0xff] }
  0xd8   : > { %v3484_v39 = vmul.f32 %v2491_v23, %v956_v45  ;;  %vm3486_vm5 = vcmp.lt.f32.partialorder %v958_v49, 0.0004427343  ;;  %v3490_v55 = vmul.f32 %v2493_v29, %v1091_v5  ;;  %vm3492_vm6 = vcmp.lt.f32.partialorder %v1093_v9, 0.0004427343  ;;  %v1218_v23 = vld [vmem:[%s3500_s23 + $0xf8] sm:$0xff] }
  0xd9   : > { %v2501_v19 = vpop.eup %2500  ;;  %v1084_v3 = vand.u32 2147483647, %v3465_v42  ;;  %2518 = vlog2.f32 %v934_v31  ;;  %v1082_v29 = vadd.f32 1.0, %v1081_v18  ;;  %v937_v45 = vmul.f32 -0.5, %v3471_v61  ;;  %v1186_v18 = vld [vmem:[%s3378_s4 + $0xf8] sm:$0xff] }
  0xda   : > { %v2503_v33 = vpop.eup %2502  ;;  %v1116_v34 = vmul.f32 0.6931472, %v2501_v19  ;;  %v3511_v9 = vmul.f32 %v2495_v35, %v947_v25  ;;  %vm3513_vm7 = vcmp.lt.f32.partialorder %v949_v26, 0.0004427343  ;;  %2520 = vpow2.f32 %v3451_v15  ;;  %v3528_v26 = vld [vmem:[%s3378_s4 + $0x78] sm:$0xff] }
  0xdb   : > { %v2505_v44 = vpop.eup %2504  ;;  %v972_v50 = vmul.f32 0.6931472, %v2503_v33  ;;  %v764_v35 = vsub.f32 0.0, %v732_v11  ;;  %vm3534_vm8 = vcmp.lt.f32.partialorder %v1084_v3, 0.0004427343  ;;  %2522 = vpow2.f32 %v3454_v21  ;;  %v1185_v11 = vld [vmem:[%s3378_s4 + $0xf0] sm:$0xff] }
  0xdc   : > { %v1122_v8 = vsel %vm3456_vm0, %v1119_v36, %v1116_v34  ;;  %v1107_v63 = vmul.f32 0.6931472, %v2505_v44  ;;  %v2507_v49 = vpop.eup %2506  ;;  %v1202_v36 = vld [vmem:[%s3500_s23 + $0x78] sm:$0xff] }
  0xdd   : > { %v3506_v5 = vadd.f32 %v1122_v8, %v706_v43  ;;  %v978_v24 = vsel %vm3461_vm1, %v975_v38, %v972_v50  ;;  %v963_v38 = vmul.f32 0.6931472, %v2507_v49  ;;  %v2509_v19 = vpop.eup %2508  ;;  %v3548_v50 = vld [vmem:[%s3378_s4 + $0x70] sm:$0xff]  ;;  %v821_v8 = vmul.f32 1.442695, %v764_v35  ;;  %v1184_v49 = vld [vmem:[%s3378_s4 + $0xe8] sm:$0xff] }
  0xde   : > { %v1138_v0 = vadd.f32 %v978_v24, %v690_v46  ;;  %v1113_v43 = vsel %vm3467_vm2, %v1110_v56, %v1107_v63  ;;  %v1098_v31 = vmul.f32 0.6931472, %v2509_v19 }
  0xdf   : > { %v1250_v25 = vmul.f32 %v1218_v23, %v3506_v5  ;;  %v3532_v15 = vadd.f32 %v1113_v43, %v705_v47  ;;  %v969_v56 = vsel %vm3474_vm3, %v966_v13, %v963_v38  ;;  %v2511_v33 = vpop.eup %2510  ;;  %v1083_v38 = vmul.f32 %v3465_v42, %v1082_v29 }
  0xe0   : > { %v1234_v46 = vmul.f32 %v1202_v36, %v1138_v0  ;;  %2524 = vrcp.f32 %v1138_v0  ;;  %v1137_v34 = vadd.f32 %v969_v56, %v689_v48  ;;  %v2513_v44 = vpop.eup %2512  ;;  %v1104_v13 = vsel %vm3478_vm4, %v1101_v60, %v1098_v31  ;;  %v1200_v60 = vld [vmem:[%s3500_s23 + $0x68] sm:$0xff] }
  0xe1   : > { %v1282_v4 = vadd.f32 %v1250_v25, %v1186_v18  ;;  %2526 = vlog2.f32 %v1138_v0  ;;  %v1249_v47 = vmul.f32 %v1217_v30, %v3532_v15  ;;  %v954_v3 = vmul.f32 0.6931472, %v2511_v33  ;;  %v3568_v30 = vld [vmem:[%s3378_s4 + $0x68] sm:$0xff]  ;;  %v1183_v25 = vld [vmem:[%s3378_s4 + $0xe0] sm:$0xff] }
  0xe2   : > { %v1266_v21 = vadd.f32 %v1234_v46, %v3528_v26  ;;  %v1233_v63 = vmul.f32 %v1201_v57, %v1137_v34  ;;  %2528 = vrcp.f32 %v1137_v34  ;;  %v3555_v7 = vadd.f32 %v1104_v13, %v704_v51  ;;  %v2515_v48 = vpop.eup %2514 }
  0xe3   : > { %2336 = vmatprep.subr.mxu0 %v1282_v4  ;;  %v1281_v23 = vadd.f32 %v1249_v47, %v1185_v11  ;;  %2530 = vlog2.f32 %v1137_v34  ;;  %v960_v14 = vsel %vm3486_vm5, %v3484_v39, %v954_v3  ;;  %v1089_v24 = vmul.f32 0.6931472, %v2513_v44  ;;  %v3607_v4 = vld [vmem:[%s3378_s4 + $0x60] sm:$0xff]  ;;  %v1198_v34 = vld [vmem:[%s3500_s23 + $0x58] sm:$0xff] }
  0xe4   : > { %2337 = vmatpush3.xpose.msra.mxu0 %v1266_v21  ;;  %v938_v36 = vadd.f32 1.0, %v937_v45  ;;  %v1265_v18 = vadd.f32 %v1233_v63, %v3548_v50  ;;  %v1248_v12 = vmul.f32 %v1216_v54, %v3555_v7  ;;  %v1136_v51 = vadd.f32 %v960_v14, %v688_v52  ;;  %v2517_v43 = vpop.eup %2516 }
  0xe5   : > { %2338 = vmatprep.subr.mxu0 %v1281_v23  ;;  %v940_v0 = vand.u32 2147483647, %v3471_v61  ;;  %v1095_v39 = vsel %vm3492_vm6, %v3490_v55, %v1089_v24  ;;  %v945_v45 = vmul.f32 0.6931472, %v2515_v48  ;;  %2532 = vpow2.f32 %v821_v8 }
  0xe6   : > { %v1280_v35 = vadd.f32 %v1248_v12, %v1184_v49  ;;  %v1232_v19 = vmul.f32 %v1200_v60, %v1136_v51  ;;  %2534 = vrcp.f32 %v1136_v51  ;;  %v3577_v17 = vadd.f32 %v1095_v39, %v703_v53  ;;  %v2519_v52 = vpop.eup %2518  ;;  %v3619_v49 = vld [vmem:[%s3378_s4 + $0x58] sm:$0xff]  ;;  %v3623_v60 = vld [vmem:[%s3385_s10 + $0xc0] sm:$0xff] }
  0xe7   : > { %2536 = vlog2.f32 %v1136_v51  ;;  %v951_v55 = vsel %vm3513_vm7, %v3511_v9, %v945_v45  ;;  %v1080_v46 = vmul.f32 0.6931472, %v2517_v43  ;;  %v939_v42 = vmul.f32 %v3471_v61, %v938_v36  ;;  %v3593_v9 = vpop.eup %2520 }
  0xe8   : > { %2339 = vmatpush3.xpose.msra.mxu0 %v1265_v18  ;;  %v1264_v29 = vadd.f32 %v1232_v19, %v3568_v30  ;;  %v1247_v20 = vmul.f32 %v1215_v41, %v3577_v17  ;;  %v1135_v53 = vadd.f32 %v951_v55, %v687_v62  ;;  %vm3589_vm9 = vcmp.lt.f32.partialorder %v940_v0, 0.0004427343  ;;  %v3604_v62 = vpop.eup %2522 }
  0xe9   : > { %2340 = vmatprep.subr.mxu0 %v1280_v35  ;;  %v1086_v61 = vsel %vm3534_vm8, %v1083_v38, %v1080_v46  ;;  %v936_v56 = vmul.f32 0.6931472, %v2519_v52  ;;  %v748_v57 = vsub.f32 0.0, %v716_v16  ;;  %v1069_v21 = vadd.f32 1.0, %v3593_v9  ;;  %v3635_v38 = vld [vmem:[%s3385_s10 + $0x40] sm:$0xff] }
  0xea   : > { %v1279_v31 = vadd.f32 %v1247_v20, %v1183_v25  ;;  %v1231_v33 = vmul.f32 %v1199_v58, %v1135_v53  ;;  %2538 = vrcp.f32 %v1135_v53  ;;  %v3602_v22 = vadd.f32 %v1086_v61, %v702_v6 }
  0xeb   : > { %2540 = vlog2.f32 %v1135_v53  ;;  %v942_v47 = vsel %vm3589_vm9, %v939_v42, %v936_v56  ;;  %v789_v3 = vmul.f32 1.442695, %v748_v57  ;;  %v925_v14 = vadd.f32 1.0, %v3604_v62 }
  0xec   : > { %2341 = vmatpush3.xpose.msra.mxu0 %v1264_v29  ;;  %v1263_v44 = vadd.f32 %v1231_v33, %v3607_v4  ;;  %v1246_v27 = vmul.f32 %v1214_v10, %v3602_v22  ;;  %v1134_v6 = vadd.f32 %v942_v47, %v686_v28  ;;  %v1794_v24 = vmul.f32 %v3528_v26, %v3528_v26 }
  0xed   : > { %v2525_v16 = vpop.eup %2524  ;;  %2342 = vmatprep.subr.mxu0 %v1279_v31  ;;  %v731_v43 = vand.u32 2147483647, %v3623_v60  ;;  %v1793_v45 = vmul.f32 %v3548_v50, %v3548_v50  ;;  %v1072_v25 = vmul.f32 -0.5, %v3593_v9  ;;  %v928_v55 = vmul.f32 -0.5, %v3604_v62 }
  0xee   : > { %v2527_v13 = vpop.eup %2526  ;;  %v1698_v54 = vmul.f32 %v2525_v16, %v2525_v16  ;;  %v1278_v23 = vadd.f32 %v1246_v27, %v1182_v2  ;;  %v1230_v63 = vmul.f32 %v1198_v34, %v1134_v6  ;;  %2542 = vrcp.f32 %v1134_v6  ;;  %v3648_v16 = vld [vmem:[%s3385_s10 + $0xb8] sm:$0xff] }
  0xef   : > { %v1618_v8 = vmul.f32 0.6931472, %v2527_v13  ;;  %v2529_v48 = vpop.eup %2528  ;;  %2544 = vlog2.f32 %v1134_v6  ;;  %v763_v42 = vsub.f32 0.0, %v731_v43  ;;  %v715_v50 = vand.u32 2147483647, %v3635_v38 }
  0xf0   : > { %2343 = vmatpush3.xpose.msra.mxu0 %v1263_v44  ;;  %v2531_v32 = vpop.eup %2530  ;;  %v1262_v36 = vadd.f32 %v1230_v63, %v3619_v49  ;;  %2546 = vlog2.f32 %v1069_v21  ;;  %v1697_v12 = vmul.f32 %v2529_v48, %v2529_v48  ;;  %v1792_v11 = vmul.f32 %v3568_v30, %v3568_v30 }
  0xf1   : > { %v1666_v28 = vmul.f32 2.0, %v1618_v8  ;;  %2344 = vmatprep.subr.mxu0 %v1278_v23  ;;  %v1616_v18 = vmul.f32 0.6931472, %v2531_v32  ;;  %2548 = vlog2.f32 %v925_v14  ;;  %v819_v61 = vmul.f32 1.442695, %v763_v42 }
  0xf2   : > { %v3628_v51 = vpop.eup %2532  ;;  %2550 = vpow2.f32 %v789_v3  ;;  %v1073_v56 = vadd.f32 1.0, %v1072_v25  ;;  %v1075_v57 = vand.u32 2147483647, %v3593_v9  ;;  %v929_v31 = vadd.f32 1.0, %v928_v55 }
  0xf3   : > { %v1730_v0 = vadd.f32 %v1698_v54, %v1666_v28  ;;  %v2535_v39 = vpop.eup %2534  ;;  %v1665_v41 = vmul.f32 2.0, %v1616_v18  ;;  %v1060_v26 = vadd.f32 1.0, %v3628_v51  ;;  %v747_v33 = vsub.f32 0.0, %v715_v50 }
  0xf4   : > { %2345 = vmatpush3.xpose.msra.mxu0 %v1262_v36  ;;  %v2537_v35 = vpop.eup %2536  ;;  %v1696_v52 = vmul.f32 %v2535_v39, %v2535_v39  ;;  %v1791_v44 = vmul.f32 %v3607_v4, %v3607_v4  ;;  %v931_v27 = vand.u32 2147483647, %v3604_v62  ;;  %v1063_v30 = vmul.f32 -0.5, %v3628_v51 }
  0xf5   : > { %v3637_v19 = vadd.f32 %v1794_v24, %v1730_v0  ;;  %v1729_v58 = vadd.f32 %v1697_v12, %v1665_v41  ;;  %v1614_v46 = vmul.f32 0.6931472, %v2537_v35  ;;  %2552 = vlog2.f32 %v1060_v26  ;;  %v3672_v0 = vld [vmem:[%s3385_s10 + $0x38] sm:$0xff]  ;;  %v1213_v26 = vld [vmem:[%s3500_s23 + $0xd0] sm:$0xff] }
  0xf6   : > { %2554 = vpow2.f32 %v819_v61  ;;  %v787_v6 = vmul.f32 1.442695, %v747_v33  ;;  %v701_v3 = vmax.f32 %v3428_v37, 0.0  ;;  %v685_v8 = vmax.f32 %v3431_v40, 0.0 }
  0xf7   : > { %v2539_v29 = vpop.eup %2538  ;;  %v3642_v20 = vadd.f32 %v1793_v45, %v1729_v58  ;;  %v1664_v53 = vmul.f32 2.0, %v1614_v46  ;;  %v1074_v63 = vmul.f32 %v3593_v9, %v1073_v56  ;;  %vm3659_vm10 = vcmp.lt.f32.partialorder %v1075_v57, 0.0004427343  ;;  %v1197_v46 = vld [vmem:[%s3500_s23 + $0x50] sm:$0xff]  ;;  %v3727_v9 = vld [vmem:[%s3385_s10 + $0x28] sm:$0xff] }
  0xf8   : > { %v2541_v10 = vpop.eup %2540  ;;  %v1695_v34 = vmul.f32 %v2539_v29, %v2539_v29  ;;  %2556 = vpow2.f32 %v787_v6  ;;  %v730_v4 = vand.u32 2147483647, %v3648_v16  ;;  %v930_v37 = vmul.f32 %v3604_v62, %v929_v31  ;;  %v1181_v29 = vld [vmem:[%s3378_s4 + $0xd0] sm:$0xff] }
  0xf9   : > { %v1728_v2 = vadd.f32 %v1696_v52, %v1664_v53  ;;  %v1612_v47 = vmul.f32 0.6931472, %v2541_v10  ;;  %v1790_v40 = vmul.f32 %v3619_v49, %v3619_v49  ;;  %vm3667_vm11 = vcmp.lt.f32.partialorder %v931_v27, 0.0004427343 }
  0xfa   : > { %v1064_v12 = vadd.f32 1.0, %v1063_v30  ;;  %v1066_v45 = vand.u32 2147483647, %v3628_v51  ;;  %v762_v52 = vsub.f32 0.0, %v730_v4  ;;  %v714_v42 = vand.u32 2147483647, %v3672_v0 }
  0xfb   : > { %v2543_v21 = vpop.eup %2542  ;;  %v3654_v13 = vadd.f32 %v1792_v11, %v1728_v2  ;;  %v1663_v54 = vmul.f32 2.0, %v1612_v47  ;;  %v700_v56 = vmax.f32 %v3443_v59, 0.0  ;;  %v1212_v59 = vld [vmem:[%s3500_s23 + $0xc8] sm:$0xff] }
  0xfc   : > { %v2545_v23 = vpop.eup %2544  ;;  %v1694_v24 = vmul.f32 %v2543_v21, %v2543_v21  ;;  %v1065_v11 = vmul.f32 %v3628_v51, %v1064_v12  ;;  %vm3695_vm12 = vcmp.lt.f32.partialorder %v1066_v45, 0.0004427343  ;;  %v817_v2 = vmul.f32 1.442695, %v762_v52  ;;  %v3707_v21 = vld [vmem:[%s3385_s10 + $0xb0] sm:$0xff] }
  0xfd   : > { %v2547_v14 = vpop.eup %2546  ;;  %v1727_v32 = vadd.f32 %v1695_v34, %v1663_v54  ;;  %v1610_v28 = vmul.f32 0.6931472, %v2545_v23  ;;  %v1165_v34 = vld [vmem:[%s3378_s4 + $0x50] sm:$0xff]  ;;  %v746_v51 = vsub.f32 0.0, %v714_v42  ;;  %v729_v4 = vand.u32 2147483647, %v3707_v21 }
  0xfe   : > { %v2549_v36 = vpop.eup %2548  ;;  %v1071_v18 = vmul.f32 0.6931472, %v2547_v14  ;;  %v684_v12 = vmax.f32 %v3447_v1, 0.0  ;;  %v712_v1 = vand.u32 2147483647, %v3727_v9 }
  0xff   : > { %v3674_v43 = vpop.eup %2550  ;;  %v3676_v39 = vadd.f32 %v1791_v44, %v1727_v32  ;;  %v1662_v41 = vmul.f32 2.0, %v1610_v28  ;;  %v927_v62 = vmul.f32 0.6931472, %v2549_v36  ;;  %v785_v48 = vmul.f32 1.442695, %v746_v51  ;;  %v3719_v28 = vld [vmem:[%s3385_s10 + $0x30] sm:$0xff] }
 0x100   : > { %v1077_v49 = vsel %vm3659_vm10, %v1074_v63, %v1071_v18  ;;  %v916_v35 = vadd.f32 1.0, %v3674_v43  ;;  %v919_v6 = vmul.f32 -0.5, %v3674_v43  ;;  %v761_v36 = vsub.f32 0.0, %v729_v4 }
 0x101   : > { %v1726_v25 = vadd.f32 %v1694_v24, %v1662_v41  ;;  %v3683_v55 = vadd.f32 %v1077_v49, %v701_v3  ;;  %v933_v58 = vsel %vm3667_vm11, %v930_v37, %v927_v62  ;;  %v922_v37 = vand.u32 2147483647, %v3674_v43  ;;  %v1211_v49 = vld [vmem:[%s3500_s23 + $0xc0] sm:$0xff] }
 0x102   : > { %v2553_v50 = vpop.eup %2552  ;;  %v1133_v53 = vadd.f32 %v933_v58, %v685_v8  ;;  %2558 = vlog2.f32 %v916_v35  ;;  %v1180_v8 = vld [vmem:[%s3378_s4 + $0xc8] sm:$0xff]  ;;  %v920_v14 = vadd.f32 1.0, %v919_v6  ;;  %v713_v18 = vand.u32 2147483647, %v3719_v28 }
 0x103   : > { %v3691_v61 = vadd.f32 %v1790_v40, %v1726_v25  ;;  %v1245_v10 = vmul.f32 %v1213_v26, %v3683_v55  ;;  %v1062_v33 = vmul.f32 0.6931472, %v2553_v50  ;;  %v3700_v44 = vpop.eup %2554  ;;  %v3723_v40 = vld [vmem:[%s3385_s10 + $0xa8] sm:$0xff]  ;;  %v815_v62 = vmul.f32 1.442695, %v761_v36 }
 0x104   : > { %v1229_v31 = vmul.f32 %v1197_v46, %v1133_v53  ;;  %2560 = vrcp.f32 %v1133_v53  ;;  %v1051_v3 = vadd.f32 1.0, %v3700_v44  ;;  %v921_v41 = vmul.f32 %v3674_v43, %v920_v14 }
 0x105   : > { %v1277_v47 = vadd.f32 %v1245_v10, %v1181_v29  ;;  %2562 = vlog2.f32 %v1133_v53  ;;  %v1068_v30 = vsel %vm3695_vm12, %v1065_v11, %v1062_v33  ;;  %v3713_v23 = vpop.eup %2556  ;;  %vm3731_vm13 = vcmp.lt.f32.partialorder %v922_v37, 0.0004427343  ;;  %v1196_v29 = vld [vmem:[%s3500_s23 + $0x48] sm:$0xff] }
 0x106   : > { %v1261_v27 = vadd.f32 %v1229_v31, %v1165_v34  ;;  %v3709_v54 = vadd.f32 %v1068_v30, %v700_v56  ;;  %2564 = vpow2.f32 %v817_v2  ;;  %v907_v32 = vadd.f32 1.0, %v3713_v23 }
 0x107   : > { %2346 = vmatprep.subr.mxu0 %v1277_v47  ;;  %2566 = vlog2.f32 %v1051_v3  ;;  %v1054_v26 = vmul.f32 -0.5, %v3700_v44  ;;  %v745_v35 = vsub.f32 0.0, %v713_v18  ;;  %v728_v52 = vand.u32 2147483647, %v3723_v40  ;;  %v3747_v3 = vld [vmem:[%s3385_s10 + $0xa0] sm:$0xff] }
 0x108   : > { %2347 = vmatpush3.xpose.msra.mxu0 %v1261_v27  ;;  %v1244_v63 = vmul.f32 %v1212_v59, %v3709_v54  ;;  %2568 = vlog2.f32 %v907_v32  ;;  %v910_v58 = vmul.f32 -0.5, %v3713_v23  ;;  %v1057_v53 = vand.u32 2147483647, %v3700_v44 }
 0x109   : > { %2570 = vpow2.f32 %v785_v48  ;;  %v783_v46 = vmul.f32 1.442695, %v745_v35  ;;  %v760_v42 = vsub.f32 0.0, %v728_v52  ;;  %v744_v11 = vsub.f32 0.0, %v712_v1 }
 0x10a   : > { %v1276_v24 = vadd.f32 %v1244_v63, %v1180_v8  ;;  %2572 = vpow2.f32 %v815_v62  ;;  %v1055_v57 = vadd.f32 1.0, %v1054_v26  ;;  %v1789_v47 = vmul.f32 %v1165_v34, %v1165_v34  ;;  %v1164_v63 = vld [vmem:[%s3378_s4 + $0x48] sm:$0xff] }
 0x10b   : > { %2574 = vpow2.f32 %v783_v46  ;;  %v813_v31 = vmul.f32 1.442695, %v760_v42  ;;  %v911_v51 = vadd.f32 1.0, %v910_v58  ;;  %v913_v59 = vand.u32 2147483647, %v3713_v23  ;;  %v1179_v46 = vld [vmem:[%s3378_s4 + $0xc0] sm:$0xff] }
 0x10c   : > { %2348 = vmatprep.subr.mxu0 %v1276_v24  ;;  %v781_v6 = vmul.f32 1.442695, %v744_v11  ;;  %v699_v48 = vmax.f32 %v3623_v60, 0.0  ;;  %v1056_v34 = vmul.f32 %v3700_v44, %v1055_v57  ;;  %vm3753_vm14 = vcmp.lt.f32.partialorder %v1057_v53, 0.0004427343  ;;  %v1163_v57 = vld [vmem:[%s3378_s4 + $0x40] sm:$0xff] }
 0x10d   : > { %v912_v36 = vmul.f32 %v3713_v23, %v911_v51  ;;  %v727_v18 = vand.u32 2147483647, %v3747_v3  ;;  %v683_v44 = vmax.f32 %v3635_v38, 0.0  ;;  %vm914_vm15 = vcmp.lt.f32.partialorder %v913_v59, 0.0004427343  ;;  %v1195_v38 = vld [vmem:[%s3500_s23 + $0x40] sm:$0xff] }
 0x10e   : > { %v1788_v59 = vmul.f32 %v1164_v63, %v1164_v63 }
 0x10f   : > { %v2559_v45 = vpop.eup %2558  ;;  %v759_v58 = vsub.f32 0.0, %v727_v18 }
 0x110   : > { %v918_v25 = vmul.f32 0.6931472, %v2559_v45 }
 0x111   : > { %v2561_v43 = vpop.eup %2560 }
 0x112   : > { %v924_v50 = vsel %vm3731_vm13, %v921_v41, %v918_v25  ;;  %v2563_v10 = vpop.eup %2562  ;;  %v1693_v2 = vmul.f32 %v2561_v43, %v2561_v43 }
 0x113   : > { %v1132_v56 = vadd.f32 %v924_v50, %v684_v12  ;;  %v1608_v33 = vmul.f32 0.6931472, %v2563_v10  ;;  %v3743_v27 = vpop.eup %2564 }
 0x114   : > { %v1042_v4 = vadd.f32 1.0, %v3743_v27  ;;  %v2567_v24 = vpop.eup %2566  ;;  %v1045_v26 = vmul.f32 -0.5, %v3743_v27 }
 0x115   : > { %v1228_v30 = vmul.f32 %v1196_v29, %v1132_v56  ;;  %2576 = vrcp.f32 %v1132_v56  ;;  %v1661_v8 = vmul.f32 2.0, %v1608_v33  ;;  %v2569_v60 = vpop.eup %2568  ;;  %v1053_v12 = vmul.f32 0.6931472, %v2567_v24  ;;  %v3782_v33 = vld [vmem:[%s3385_s10 + $0x20] sm:$0xff] }
 0x116   : > { %2578 = vlog2.f32 %v1132_v56  ;;  %v3760_v41 = vpop.eup %2570  ;;  %v909_v45 = vmul.f32 0.6931472, %v2569_v60  ;;  %v1046_v53 = vadd.f32 1.0, %v1045_v26 }
 0x117   : > { %v1260_v14 = vadd.f32 %v1228_v30, %v1164_v63  ;;  %2580 = vpow2.f32 %v813_v31  ;;  %v1725_v37 = vadd.f32 %v1693_v2, %v1661_v8  ;;  %v1059_v23 = vsel %vm3753_vm14, %v1056_v34, %v1053_v12  ;;  %v3772_v1 = vpop.eup %2572 }
 0x118   : > { %2582 = vlog2.f32 %v1042_v4  ;;  %v898_v35 = vadd.f32 1.0, %v3760_v41  ;;  %v3769_v52 = vadd.f32 %v1059_v23, %v699_v48  ;;  %v915_v25 = vsel %vm914_vm15, %v912_v36, %v909_v45  ;;  %v3778_v10 = vpop.eup %2574 }
 0x119   : > { %2349 = vmatpush3.xpose.msra.mxu0 %v1260_v14  ;;  %2584 = vpow2.f32 %v781_v6  ;;  %v3762_v62 = vadd.f32 %v1789_v47, %v1725_v37  ;;  %v1131_v42 = vadd.f32 %v915_v25, %v683_v44  ;;  %v1033_v50 = vadd.f32 1.0, %v3772_v1  ;;  %v1210_v25 = vld [vmem:[%s3500_s23 + $0xb8] sm:$0xff] }
 0x11a   : > { %2586 = vlog2.f32 %v898_v35  ;;  %v1243_v43 = vmul.f32 %v1211_v49, %v3769_v52  ;;  %v901_v11 = vmul.f32 -0.5, %v3760_v41  ;;  %v811_v31 = vmul.f32 1.442695, %v759_v58 }
 0x11b   : > { %v1227_v29 = vmul.f32 %v1195_v38, %v1131_v42  ;;  %2588 = vrcp.f32 %v1131_v42  ;;  %v1048_v47 = vand.u32 2147483647, %v3743_v27  ;;  %v889_v51 = vadd.f32 1.0, %v3778_v10 }
 0x11c   : > { %v1275_v56 = vadd.f32 %v1243_v43, %v1179_v46  ;;  %2590 = vlog2.f32 %v1131_v42  ;;  %v1047_v8 = vmul.f32 %v3743_v27, %v1046_v53  ;;  %v902_v48 = vadd.f32 1.0, %v901_v11 }
 0x11d   : > { %v1259_v2 = vadd.f32 %v1227_v29, %v1163_v57  ;;  %2592 = vlog2.f32 %v1033_v50  ;;  %v711_v4 = vand.u32 2147483647, %v3782_v33  ;;  %v1036_v24 = vmul.f32 -0.5, %v3772_v1  ;;  %v1178_v29 = vld [vmem:[%s3378_s4 + $0xb8] sm:$0xff] }
 0x11e   : > { %2350 = vmatprep.subr.mxu0 %v1275_v56  ;;  %2594 = vlog2.f32 %v889_v51  ;;  %v698_v63 = vmax.f32 %v3648_v16, 0.0  ;;  %vm3792_vm0 = vcmp.lt.f32.partialorder %v1048_v47, 0.0004427343  ;;  %v904_v45 = vand.u32 2147483647, %v3760_v41 }
 0x11f   : > { %2351 = vmatpush3.xpose.msra.mxu0 %v1259_v2  ;;  %2596 = vpow2.f32 %v811_v31  ;;  %v743_v18 = vsub.f32 0.0, %v711_v4  ;;  %v892_v23 = vmul.f32 -0.5, %v3778_v10  ;;  %v903_v49 = vmul.f32 %v3760_v41, %v902_v48 }
 0x120   : > { %v1037_v38 = vadd.f32 1.0, %v1036_v24  ;;  %v1039_v58 = vand.u32 2147483647, %v3772_v1  ;;  %v895_v42 = vand.u32 2147483647, %v3778_v10  ;;  %v682_v53 = vmax.f32 %v3672_v0, 0.0 }
 0x121   : > { %v779_v43 = vmul.f32 1.442695, %v743_v18  ;;  %vm3814_vm1 = vcmp.lt.f32.partialorder %v904_v45, 0.0004427343  ;;  %v893_v56 = vadd.f32 1.0, %v892_v23  ;;  %v1787_v31 = vmul.f32 %v1163_v57, %v1163_v57 }
 0x122   : > { %v2577_v30 = vpop.eup %2576  ;;  %vm3822_vm2 = vcmp.lt.f32.partialorder %v1039_v58, 0.0004427343  ;;  %v681_v0 = vmax.f32 %v3719_v28, 0.0  ;;  %vm3833_vm3 = vcmp.lt.f32.partialorder %v895_v42, 0.0004427343  ;;  %v1209_v42 = vld [vmem:[%s3500_s23 + $0xb0] sm:$0xff] }
 0x123   : > { %v2579_v6 = vpop.eup %2578  ;;  %v1692_v32 = vmul.f32 %v2577_v30, %v2577_v30  ;;  %v697_v30 = vmax.f32 %v3707_v21, 0.0  ;;  %v894_v24 = vmul.f32 %v3778_v10, %v893_v56  ;;  %v1193_v56 = vld [vmem:[%s3500_s23 + $0x30] sm:$0xff] }
 0x124   : > { %v3788_v14 = vpop.eup %2580  ;;  %v1606_v34 = vmul.f32 0.6931472, %v2579_v6 }
 0x125   : > { %v2583_v37 = vpop.eup %2582  ;;  %v1024_v27 = vadd.f32 1.0, %v3788_v14  ;;  %v1027_v51 = vmul.f32 -0.5, %v3788_v14  ;;  %v1030_v28 = vand.u32 2147483647, %v3788_v14 }
 0x126   : > { %v3797_v60 = vpop.eup %2584  ;;  %v1660_v12 = vmul.f32 2.0, %v1606_v34  ;;  %v1044_v44 = vmul.f32 0.6931472, %v2583_v37  ;;  %v1194_v34 = vld [vmem:[%s3500_s23 + $0x38] sm:$0xff] }
 0x127   : > { %2598 = vlog2.f32 %v1024_v27  ;;  %v880_v16 = vadd.f32 1.0, %v3797_v60  ;;  %v2587_v50 = vpop.eup %2586  ;;  %v883_v37 = vmul.f32 -0.5, %v3797_v60  ;;  %v1028_v18 = vadd.f32 1.0, %v1027_v51  ;;  %v1177_v51 = vld [vmem:[%s3378_s4 + $0xb0] sm:$0xff] }
 0x128   : > { %v1724_v26 = vadd.f32 %v1692_v32, %v1660_v12  ;;  %v1050_v35 = vsel %vm3792_vm0, %v1047_v8, %v1044_v44  ;;  %v900_v47 = vmul.f32 0.6931472, %v2587_v50  ;;  %v3828_v8 = vld [vmem:[%s3385_s10 + $0x98] sm:$0xff]  ;;  %v2589_v48 = vpop.eup %2588  ;;  %v886_v10 = vand.u32 2147483647, %v3797_v60 }
 0x129   : > { %v3807_v46 = vadd.f32 %v1050_v35, %v698_v63  ;;  %2600 = vlog2.f32 %v880_v16  ;;  %v2591_v21 = vpop.eup %2590  ;;  %v1691_v27 = vmul.f32 %v2589_v48, %v2589_v48  ;;  %v726_v12 = vand.u32 2147483647, %v3828_v8 }
 0x12a   : > { %v3810_v41 = vadd.f32 %v1788_v59, %v1724_v26  ;;  %v1038_v59 = vmul.f32 %v3772_v1, %v1037_v38  ;;  %v906_v57 = vsel %vm3814_vm1, %v903_v49, %v900_v47  ;;  %2602 = vpow2.f32 %v779_v43  ;;  %v2593_v63 = vpop.eup %2592  ;;  %v3845_v26 = vld [vmem:[%s3378_s4 + $0x38] sm:$0xff] }
 0x12b   : > { %v1242_v2 = vmul.f32 %v1210_v25, %v3807_v46  ;;  %v1130_v1 = vadd.f32 %v906_v57, %v682_v53  ;;  %v1604_v36 = vmul.f32 0.6931472, %v2591_v21  ;;  %v2595_v44 = vpop.eup %2594  ;;  %v1035_v23 = vmul.f32 0.6931472, %v2593_v63 }
 0x12c   : > { %v3842_v49 = vpop.eup %2596  ;;  %v891_v35 = vmul.f32 0.6931472, %v2595_v44  ;;  %v758_v25 = vsub.f32 0.0, %v726_v12  ;;  %v884_v43 = vadd.f32 1.0, %v883_v37  ;;  %vm3860_vm4 = vcmp.lt.f32.partialorder %v1030_v28, 0.0004427343 }
 0x12d   : > { %v1274_v4 = vadd.f32 %v1242_v2, %v1178_v29  ;;  %v1226_v45 = vmul.f32 %v1194_v34, %v1130_v1  ;;  %2604 = vrcp.f32 %v1130_v1  ;;  %v1659_v16 = vmul.f32 2.0, %v1604_v36  ;;  %v1208_v28 = vld [vmem:[%s3500_s23 + $0xa8] sm:$0xff]  ;;  %v3882_v36 = vld [vmem:[%s3385_s10 + $0x18] sm:$0xff] }
 0x12e   : > { %2606 = vlog2.f32 %v1130_v1  ;;  %v1041_v58 = vsel %vm3822_vm2, %v1038_v59, %v1035_v23  ;;  %v1015_v50 = vadd.f32 1.0, %v3842_v49  ;;  %v897_v11 = vsel %vm3833_vm3, %v894_v24, %v891_v35  ;;  %v3874_v24 = vld [vmem:[%s3378_s4 + $0x30] sm:$0xff]  ;;  %v1192_v44 = vld [vmem:[%s3500_s23 + $0x28] sm:$0xff] }
 0x12f   : > { %2352 = vmatprep.subr.mxu0 %v1274_v4  ;;  %v1258_v38 = vadd.f32 %v1226_v45, %v3845_v26  ;;  %v1723_v29 = vadd.f32 %v1691_v27, %v1659_v16  ;;  %v3852_v53 = vadd.f32 %v1041_v58, %v697_v30  ;;  %v1029_v2 = vmul.f32 %v3788_v14, %v1028_v18  ;;  %v1176_v45 = vld [vmem:[%s3378_s4 + $0xa8] sm:$0xff] }
 0x130   : > { %v1129_v48 = vadd.f32 %v897_v11, %v681_v0  ;;  %v696_v59 = vmax.f32 %v3723_v40, 0.0  ;;  %2608 = vlog2.f32 %v1015_v50  ;;  %v809_v34 = vmul.f32 1.442695, %v758_v25  ;;  %v3894_v50 = vld [vmem:[%s3378_s4 + $0x28] sm:$0xff] }
 0x131   : > { %2353 = vmatpush3.xpose.msra.mxu0 %v1258_v38  ;;  %v3864_v30 = vadd.f32 %v1787_v31, %v1723_v29  ;;  %v1241_v4 = vmul.f32 %v1209_v42, %v3852_v53  ;;  %v680_v21 = vmax.f32 %v3727_v9, 0.0  ;;  %v885_v0 = vmul.f32 %v3797_v60, %v884_v43  ;;  %v3897_v29 = vld [vmem:[%s3385_s10 + $0x90] sm:$0xff] }
 0x132   : > { %v1225_v32 = vmul.f32 %v1193_v56, %v1129_v48  ;;  %vm3869_vm5 = vcmp.lt.f32.partialorder %v886_v10, 0.0004427343  ;;  %2610 = vrcp.f32 %v1129_v48  ;;  %v1018_v37 = vmul.f32 -0.5, %v3842_v49 }
 0x133   : > { %v1273_v1 = vadd.f32 %v1241_v4, %v1177_v51  ;;  %2612 = vlog2.f32 %v1129_v48  ;;  %v710_v25 = vand.u32 2147483647, %v3882_v36  ;;  %v1021_v42 = vand.u32 2147483647, %v3842_v49 }
 0x134   : > { %v2599_v47 = vpop.eup %2598  ;;  %v1257_v9 = vadd.f32 %v1225_v32, %v3874_v24  ;;  %2614 = vpow2.f32 %v809_v34  ;;  %v1019_v35 = vadd.f32 1.0, %v1018_v37  ;;  %v1786_v51 = vmul.f32 %v3845_v26, %v3845_v26 }
 0x135   : > { %v1026_v57 = vmul.f32 0.6931472, %v2599_v47  ;;  %2354 = vmatprep.subr.mxu0 %v1273_v1  ;;  %v5020_v47 = vlaneseq  ;;  %vm3904_vm6 = vcmp.lt.f32.partialorder %v1021_v42, 0.0004427343  ;;  %v3919_v37 = vstv %s2289_s30 }
 0x136   : > { %v2601_v14 = vpop.eup %2600  ;;  %2355 = vmatpush3.xpose.msra.mxu0 %v1257_v9  ;;  %v1020_v48 = vmul.f32 %v3842_v49, %v1019_v35  ;;  %v679_v34 = vmax.f32 %v3782_v33, 0.0 }
 0x137   : > { %v1032_v31 = vsel %vm3860_vm4, %v1029_v2, %v1026_v57  ;;  %v882_v63 = vmul.f32 0.6931472, %v2601_v14  ;;  %v3884_v27 = vpop.eup %2602  ;;  %v695_v57 = vmax.f32 %v3747_v3, 0.0  ;;  %v725_v14 = vand.u32 2147483647, %v3897_v29 }
 0x138   : > { %v1144_v60 = vadd.f32 %v1032_v31, %v696_v59  ;;  %v871_v10 = vadd.f32 1.0, %v3884_v27  ;;  %v742_v59 = vsub.f32 0.0, %v710_v25  ;;  %v874_v49 = vmul.f32 -0.5, %v3884_v27  ;;  %v1207_v31 = vld [vmem:[%s3500_s23 + $0xa0] sm:$0xff] }
 0x139   : > { %v888_v12 = vsel %vm3869_vm5, %v885_v0, %v882_v63  ;;  %v757_v0 = vsub.f32 0.0, %v725_v14  ;;  %v3912_v1 = vshrl.u32 %v5020_v47, 7  ;;  %v3922_v9 = vand.u32 127, %v5020_v47 }
 0x13a   : > { %v1240_v18 = vmul.f32 %v1208_v28, %v1144_v60  ;;  %2616 = vrcp.f32 %v1144_v60  ;;  %v1128_v23 = vadd.f32 %v888_v12, %v680_v21  ;;  %v2605_v38 = vpop.eup %2604  ;;  %v777_v21 = vmul.f32 1.442695, %v742_v59 }
 0x13b   : > { %2618 = vlog2.f32 %v1144_v60  ;;  %v2607_v43 = vpop.eup %2606  ;;  %v1690_v56 = vmul.f32 %v2605_v38, %v2605_v38  ;;  %v875_v25 = vadd.f32 1.0, %v874_v49  ;;  %vm1490_vm9 = vcmp.lt.s32.totalorder %v3922_v9, 32 }
 0x13c   : > { %v1272_v16 = vadd.f32 %v1240_v18, %v1176_v45  ;;  %v1224_v58 = vmul.f32 %v1192_v44, %v1128_v23  ;;  %2620 = vrcp.f32 %v1128_v23  ;;  %v1602_v11 = vmul.f32 0.6931472, %v2607_v43 }
 0x13d   : > { %2622 = vlog2.f32 %v1128_v23  ;;  %v2609_v6 = vpop.eup %2608  ;;  %v877_v23 = vand.u32 2147483647, %v3884_v27  ;;  %v1785_v43 = vmul.f32 %v3874_v24, %v3874_v24  ;;  %v3948_v24 = vld [vmem:[%s3385_s10 + $0x10] sm:$0xff] }
 0x13e   : > { %2356 = vmatprep.subr.mxu0 %v1272_v16  ;;  %v1256_v2 = vadd.f32 %v1224_v58, %v3894_v50  ;;  %2624 = vlog2.f32 %v871_v10  ;;  %v1658_v4 = vmul.f32 2.0, %v1602_v11  ;;  %v1017_v32 = vmul.f32 0.6931472, %v2609_v6 }
 0x13f   : > { %v2611_v40 = vpop.eup %2610  ;;  %2626 = vpow2.f32 %v777_v21  ;;  %v807_v10 = vmul.f32 1.442695, %v757_v0  ;;  %v1800_v11 = vmul.f32 %v1176_v45, %v1176_v45  ;;  %vm3943_vm7 = vcmp.lt.f32.partialorder %v877_v23, 0.0004427343 }
 0x140   : > { %2357 = vmatpush3.xpose.msra.mxu0 %v1256_v2  ;;  %v1722_v26 = vadd.f32 %v1690_v56, %v1658_v4  ;;  %v1023_v3 = vsel %vm3904_vm6, %v1020_v48, %v1017_v32  ;;  %v2613_v28 = vpop.eup %2612  ;;  %v1689_v44 = vmul.f32 %v2611_v40, %v2611_v40  ;;  %v3933_v56 = vld [vmem:[%s3378_s4 + $0xa0] sm:$0xff]  ;;  %v876_v21 = vmul.f32 %v3884_v27, %v875_v25 }
 0x141   : > { %v1143_v63 = vadd.f32 %v1023_v3, %v695_v57  ;;  %v3926_v18 = vpop.eup %2614  ;;  %v1600_v12 = vmul.f32 0.6931472, %v2613_v28  ;;  %v3936_v2 = vld [vmem:[%s3385_s10] sm:$0xff]  ;;  %v1784_v23 = vmul.f32 %v3894_v50, %v3894_v50 }
 0x142   : > { %v3924_v60 = vadd.f32 %v1786_v51, %v1722_v26  ;;  %v1006_v38 = vadd.f32 1.0, %v3926_v18  ;;  %v3939_v51 = vld [vmem:[%s3385_s10 + $0x8] sm:$0xff]  ;;  %v707_v26 = vand.u32 2147483647, %v3936_v2  ;;  %v1191_v25 = vld [vmem:[%s3500_s23 + $0x20] sm:$0xff] }
 0x143   : > { %v1239_v35 = vmul.f32 %v1207_v31, %v1143_v63  ;;  %2628 = vrcp.f32 %v1143_v63  ;;  %v1657_v42 = vmul.f32 2.0, %v1600_v12  ;;  %v708_v49 = vand.u32 2147483647, %v3939_v51 }
 0x144   : > { %2630 = vlog2.f32 %v1143_v63  ;;  %v1009_v31 = vmul.f32 -0.5, %v3926_v18  ;;  %v709_v12 = vand.u32 2147483647, %v3948_v24 }
 0x145   : > { %v1271_v6 = vadd.f32 %v1239_v35, %v3933_v56  ;;  %2632 = vlog2.f32 %v1006_v38  ;;  %v1721_v57 = vadd.f32 %v1689_v44, %v1657_v42  ;;  %v739_v44 = vsub.f32 0.0, %v707_v26  ;;  %v3981_v26 = vld [vmem:[%s3378_s4 + $0x20] sm:$0xff] }
 0x146   : > { %2634 = vpow2.f32 %v807_v10  ;;  %v740_v10 = vsub.f32 0.0, %v708_v49  ;;  %v741_v38 = vsub.f32 0.0, %v709_v12  ;;  %v1406_v42 = vadd.s32 120, %v3912_v1 }
 0x147   : > { %v2617_v16 = vpop.eup %2616  ;;  %2358 = vmatprep.subr.mxu0 %v1271_v6  ;;  %v3953_v40 = vadd.f32 %v1785_v43, %v1721_v57  ;;  %2636 = vlog2.f32 %v3506_v5  ;;  %v1010_v50 = vadd.f32 1.0, %v1009_v31 }
 0x148   : > { %v2619_v58 = vpop.eup %2618  ;;  %v1704_v59 = vmul.f32 %v2617_v16, %v2617_v16  ;;  %2638 = vlog2.f32 %v3555_v7  ;;  %v773_v6 = vmul.f32 1.442695, %v740_v10 }
 0x149   : > { %v1630_v48 = vmul.f32 0.6931472, %v2619_v58  ;;  %v2621_v4 = vpop.eup %2620  ;;  %v771_v58 = vmul.f32 1.442695, %v739_v44  ;;  %v1011_v12 = vmul.f32 %v3926_v18, %v1010_v50 }
 0x14a   : > { %v2623_v45 = vpop.eup %2622  ;;  %v1688_v3 = vmul.f32 %v2621_v4, %v2621_v4 }
 0x14b   : > { %v1672_v32 = vmul.f32 2.0, %v1630_v48  ;;  %v2625_v0 = vpop.eup %2624  ;;  %v1598_v33 = vmul.f32 0.6931472, %v2623_v45  ;;  %2640 = vpow2.f32 %v771_v58  ;;  %v775_v45 = vmul.f32 1.442695, %v741_v38 }
 0x14c   : > { %v873_v63 = vmul.f32 0.6931472, %v2625_v0  ;;  %2642 = vrcp.f32 %v3577_v17  ;;  %v1402_v0 = vadd.s32 88, %v3912_v1  ;;  %v1799_v58 = vmul.f32 %v3933_v56, %v3933_v56 }
 0x14d   : > { %v1736_v28 = vadd.f32 %v1704_v59, %v1672_v32  ;;  %v1656_v27 = vmul.f32 2.0, %v1598_v33  ;;  %v3969_v59 = vpop.eup %2626  ;;  %v1405_v32 = vadd.s32 112, %v3912_v1  ;;  %v1401_v33 = vadd.s32 80, %v3912_v1 }
 0x14e   : > { %v879_v35 = vsel %vm3943_vm7, %v876_v21, %v873_v63  ;;  %v862_v14 = vadd.f32 1.0, %v3969_v59  ;;  %v1404_v21 = vadd.s32 104, %v3912_v1  ;;  %v694_v63 = vmax.f32 %v3828_v8, 0.0 }
 0x14f   : > { %v3960_v16 = vadd.f32 %v1800_v11, %v1736_v28  ;;  %v1720_v43 = vadd.f32 %v1688_v3, %v1656_v27  ;;  %v3967_v48 = vadd.f32 %v879_v35, %v679_v34  ;;  %v1012_v11 = vand.u32 2147483647, %v3926_v18 }
 0x150   : > { %v1403_v34 = vadd.s32 96, %v3912_v1  ;;  %v2629_v49 = vpop.eup %2628  ;;  %2644 = vlog2.f32 %v862_v14  ;;  %v1400_v28 = vadd.s32 72, %v3912_v1  ;;  %v1438_v8 = vadd.s32 %v3919_v37, %v1405_v32 }
 0x151   : > { %5119 = vst [vmem:[#allocation28_spill] sm:$0xff] %v3960_v16  ;;  %v3972_v4 = vadd.f32 %v1784_v23, %v1720_v43  ;;  %v1223_v57 = vmul.f32 %v1191_v25, %v3967_v48  ;;  %v2631_v31 = vpop.eup %2630  ;;  %2646 = vpow2.f32 %v773_v6  ;;  %v1703_v23 = vmul.f32 %v2629_v49, %v2629_v49  ;;  %v1206_v6 = vld [vmem:[%s3500_s23 + $0x98] sm:$0xff]  ;;  %v1205_v16 = vld [vmem:[%s3500_s23 + $0x90] sm:$0xff] }
 0x152   : > { %v2633_v44 = vpop.eup %2632  ;;  %v1628_v27 = vmul.f32 0.6931472, %v2631_v31  ;;  %vm3989_vm8 = vcmp.lt.f32.partialorder %v1012_v11, 0.0004427343  ;;  %2648 = vpow2.f32 %v775_v45  ;;  %v1439_v25 = vadd.s32 %v3919_v37, %v1406_v42  ;;  %v4015_v45 = vld [vmem:[%s3385_s10 + $0x80] sm:$0xff] }
 0x153   : > { %v1255_v3 = vadd.f32 %v1223_v57, %v3981_v26  ;;  %v3993_v35 = vpop.eup %2634  ;;  %2650 = vlog2.f32 %v3577_v17  ;;  %v1008_v18 = vmul.f32 0.6931472, %v2633_v44  ;;  %v865_v43 = vmul.f32 -0.5, %v3969_v59  ;;  %v4034_v44 = vld [vmem:[%s3378_s4 + $0x98] sm:$0xff] }
 0x154   : > { %v1671_v38 = vmul.f32 2.0, %v1628_v27  ;;  %v997_v50 = vadd.f32 1.0, %v3993_v35  ;;  %v4004_v11 = vadd.s32 %v3919_v37, %v1404_v21  ;;  %2652 = vrcp.f32 %v3602_v22  ;;  %v4017_v32 = vpop.eup %2636 }
 0x155   : > { %2359 = vmatpush3.xpose.msra.mxu0 %v1255_v3  ;;  %v1399_v42 = vadd.s32 64, %v3912_v1  ;;  %v1014_v17 = vsel %vm3989_vm8, %v1011_v12, %v1008_v18  ;;  %v4012_v57 = vadd.s32 %v3919_v37, %v1403_v34  ;;  %5122 = vst [vmem:[#allocation29_spill] sm:$0xff] %v4017_v32  ;;  %vm1473_vm10 = vcmp.lt.s32.totalorder %v1439_v25, 384  ;;  %v4027_v3 = vld [vmem:[%s3385_s10 + $0x88] sm:$0xff]  ;;  %v4031_v12 = vpop.eup %2638  ;;  %s5277_s10 = sld [smem:[#allocation59_spill]] }
 0x156   : > { %v1735_v56 = vadd.f32 %v1703_v23, %v1671_v38  ;;  %v1142_v14 = vadd.f32 %v1014_v17, %v694_v63  ;;  %2654 = vlog2.f32 %v997_v50  ;;  %v4021_v21 = vadd.s32 %v3919_v37, %v1402_v0  ;;  %5123 = vst [vmem:[#allocation30_spill] sm:$0xff] %v4031_v12  ;;  %vm4057_vm12 = vmand %vm1473_vm10, %vm1490_vm9  ;;  %v4360_v32 = vld [vmem:[%s3378_s4 + $0x8] sm:$0xff] }
 0x157   : > { %2656 = vlog2.f32 %v3602_v22  ;;  %v4024_v49 = vadd.s32 %v3919_v37, %v1401_v33  ;;  %v866_v63 = vadd.f32 1.0, %v865_v43  ;;  %vm1472_vm11 = vcmp.lt.s32.totalorder %v1438_v8, 384 }
 0x158   : > { %v4029_v34 = vadd.f32 %v1799_v58, %v1735_v56  ;;  %v1238_v31 = vmul.f32 %v1206_v6, %v1142_v14  ;;  %2658 = vrcp.f32 %v1142_v14  ;;  %v868_v22 = vand.u32 2147483647, %v3969_v59  ;;  %v4038_v27 = vpop.eup %2640  ;;  %vm4072_vm13 = vmand %vm1472_vm11, %vm1490_vm9 }
 0x159   : > { %2660 = vlog2.f32 %v1142_v14  ;;  %v723_v0 = vand.u32 2147483647, %v4015_v45  ;;  %v1000_v23 = vmul.f32 -0.5, %v3993_v35  ;;  %v724_v10 = vand.u32 2147483647, %v4027_v3  ;;  %v4052_v43 = vpop.eup %2642 }
 0x15a   : > { %2662 = vrcp.f32 %v3683_v55  ;;  %v1270_v33 = vadd.f32 %v1238_v31, %v4034_v44  ;;  %v4045_v18 = vadd.f32 -1.0, %v3637_v19  ;;  %v4049_v38 = vadd.s32 %v3919_v37, %v1400_v28  ;;  %5125 = vst [vmem:[#allocation32_spill] sm:$0xff] %v4052_v43 }
 0x15b   : > { %2664 = vlog2.f32 %v3683_v55  ;;  %v835_v58 = vadd.f32 1.0, %v4038_v27  ;;  %v5126_v50 = vmov 0  ;;  %v4062_v17 = vadd.f32 -1.0, %v3642_v20 }
 0x15c   : > { %5124 = vst [vmem:[#allocation31_spill] sm:$0xff] %v4045_v18  ;;  %v5127_v50 = vsel %vm4057_vm12, 4294967295, %v5126_v50  ;;  %2666 = vlog2.f32 %v3709_v54  ;;  %v4066_v19 = vadd.s32 %v3919_v37, %v1399_v42  ;;  %2360 = vmatprep.subr.mxu0 %v1270_v33  ;;  %v867_v55 = vmul.f32 %v3969_v59, %v866_v63 }
 0x15d   : > { %5128 = vst [vmem:[#allocation33_spill] sm:$0xff] %v5127_v50  ;;  %5129 = vst [vmem:[#allocation34_spill] sm:$0xff] %v4062_v17  ;;  %v2645_v28 = vpop.eup %2644  ;;  %v5130_v25 = vmov 0  ;;  %v678_v6 = vmax.f32 %v3882_v36, 0.0  ;;  %vm4077_vm14 = vcmp.lt.f32.partialorder %v868_v22, 0.0004427343  ;;  %2668 = vlog2.f32 %v835_v58 }
 0x15e   : > { %v5131_v25 = vsel %vm4072_vm13, 4294967295, %v5130_v25  ;;  %v755_v42 = vsub.f32 0.0, %v723_v0  ;;  %v4081_v56 = vpop.eup %2646  ;;  %2670 = vrcp.f32 %v3709_v54  ;;  %v864_v59 = vmul.f32 0.6931472, %v2645_v28 }
 0x15f   : > { %5132 = vst [vmem:[#allocation35_spill] sm:$0xff] %v5131_v25  ;;  %v1001_v14 = vadd.f32 1.0, %v1000_v23  ;;  %v756_v8 = vsub.f32 0.0, %v724_v10  ;;  %v4084_v31 = vpop.eup %2648  ;;  %2672 = vrcp.f32 %v3769_v52  ;;  %v1003_v63 = vand.u32 2147483647, %v3993_v35  ;;  %v1190_v23 = vld [vmem:[%s3500_s23 + $0x18] sm:$0xff] }
 0x160   : > { %v844_v22 = vadd.f32 1.0, %v4081_v56  ;;  %v4092_v0 = vpop.eup %2650  ;;  %2674 = vlog2.f32 %v3769_v52  ;;  %v870_v33 = vsel %vm4077_vm14, %v867_v55, %v864_v59  ;;  %v853_v10 = vadd.f32 1.0, %v4084_v31 }
 0x161   : > { %5135 = vst [vmem:[#allocation36_spill] sm:$0xff] %v4092_v0  ;;  %vm1471_vm15 = vcmp.lt.s32.totalorder %v4004_v11, 384  ;;  %v4103_v58 = vadd.f32 %v870_v33, %v678_v6  ;;  %v838_v28 = vmul.f32 -0.5, %v4038_v27  ;;  %v803_v47 = vmul.f32 1.442695, %v755_v42  ;;  %v4106_v36 = vpop.eup %2652 }
 0x162   : > { %2676 = vlog2.f32 %v844_v22  ;;  %5136 = vst [vmem:[#allocation37_spill] sm:$0xff] %v4106_v36  ;;  %v4109_v54 = vadd.f32 -1.0, %v3654_v13  ;;  %vm1470_vm0 = vcmp.lt.s32.totalorder %v4012_v57, 384  ;;  %v1002_v52 = vmul.f32 %v3993_v35, %v1001_v14  ;;  %vm4175_vm6 = vmand %vm1471_vm15, %vm1490_vm9 }
 0x163   : > { %2678 = vlog2.f32 %v853_v10  ;;  %v805_v55 = vmul.f32 1.442695, %v756_v8  ;;  %v2655_v20 = vpop.eup %2654  ;;  %vm1469_vm1 = vcmp.lt.s32.totalorder %v4021_v21, 384  ;;  %v1222_v6 = vmul.f32 %v1190_v23, %v4103_v58  ;;  %v4131_v8 = vld [vmem:[%s3378_s4 + $0x18] sm:$0xff]  ;;  %vm4187_vm8 = vmand %vm1470_vm0, %vm1490_vm9 }
 0x164   : > { %5137 = vst [vmem:[#allocation38_spill] sm:$0xff] %v4109_v54  ;;  %2680 = vlog2.f32 %v3807_v46  ;;  %v693_v42 = vmax.f32 %v3897_v29, 0.0  ;;  %vm4117_vm2 = vcmp.lt.f32.partialorder %v1003_v63, 0.0004427343  ;;  %v4121_v13 = vpop.eup %2656  ;;  %v4124_v35 = vadd.f32 -1.0, %v3676_v39  ;;  %vm4201_vm10 = vmand %vm1469_vm1, %vm1490_vm9 }
 0x165   : > { %5140 = vst [vmem:[#allocation39_spill] sm:$0xff] %v4121_v13  ;;  %2682 = vrcp.f32 %v3807_v46  ;;  %v4128_v14 = vadd.s32 56, %v3912_v1  ;;  %v999_v22 = vmul.f32 0.6931472, %v2655_v20  ;;  %v2659_v33 = vpop.eup %2658  ;;  %v1254_v29 = vadd.f32 %v1222_v6, %v4131_v8 }
 0x166   : > { %5141 = vst [vmem:[#allocation40_spill] sm:$0xff] %v4124_v35  ;;  %v839_v63 = vadd.f32 1.0, %v838_v28  ;;  %v847_v23 = vmul.f32 -0.5, %v4081_v56  ;;  %2684 = vpow2.f32 %v803_v47  ;;  %v2661_v10 = vpop.eup %2660  ;;  %v841_v46 = vand.u32 2147483647, %v4038_v27 }
 0x167   : > { %v1005_v39 = vsel %vm4117_vm2, %v1002_v52, %v999_v22  ;;  %v856_v18 = vmul.f32 -0.5, %v4084_v31  ;;  %2686 = vpow2.f32 %v805_v55  ;;  %v4140_v50 = vpop.eup %2662  ;;  %v1626_v20 = vmul.f32 0.6931472, %v2661_v10  ;;  %2361 = vmatpush3.xpose.msra.mxu0 %v1254_v29 }
 0x168   : > { %5142 = vst [vmem:[#allocation41_spill] sm:$0xff] %v4140_v50  ;;  %2688 = vrcp.f32 %v3852_v53  ;;  %v1702_v6 = vmul.f32 %v2659_v33, %v2659_v33  ;;  %v4143_v28 = vadd.f32 %v1005_v39, %v693_v42  ;;  %v4145_v47 = vpop.eup %2664  ;;  %v4148_v52 = vadd.f32 -1.0, %v3691_v61  ;;  %v4159_v61 = vld [vmem:[%s3378_s4 + $0x90] sm:$0xff]  ;;  %v4356_v50 = vld [vmem:[%s3378_s4] sm:$0xff] }
 0x169   : > { %5143 = vst [vmem:[#allocation42_spill] sm:$0xff] %v4145_v47  ;;  %2690 = vlog2.f32 %v3852_v53  ;;  %v1798_v55 = vmul.f32 %v4034_v44, %v4034_v44  ;;  %v675_v59 = vmax.f32 %v3936_v2, 0.0  ;;  %v2667_v22 = vpop.eup %2666  ;;  %v1670_v17 = vmul.f32 2.0, %v1626_v20  ;;  %5175 = vst [vmem:[#allocation56_spill] sm:$0xff] %v4356_v50  ;;  %v1203_v53 = vld [vmem:[%s3500_s23 + $0x80] sm:$0xff] }
 0x16a   : > { %5144 = vst [vmem:[#allocation43_spill] sm:$0xff] %v4148_v52  ;;  %v1237_v33 = vmul.f32 %v1205_v16, %v4143_v28  ;;  %v840_v29 = vmul.f32 %v4038_v27, %v839_v63  ;;  %v848_v42 = vadd.f32 1.0, %v847_v23  ;;  %v2669_v10 = vpop.eup %2668  ;;  %vm1468_vm3 = vcmp.lt.s32.totalorder %v4024_v49, 384 }
 0x16b   : > { %2692 = vlog2.f32 %v3967_v48  ;;  %vm4161_vm4 = vcmp.lt.f32.partialorder %v841_v46, 0.0004427343  ;;  %v850_v2 = vand.u32 2147483647, %v4081_v56  ;;  %v857_v44 = vadd.f32 1.0, %v856_v18  ;;  %v2671_v39 = vpop.eup %2670  ;;  %vm4265_vm15 = vmand %vm1468_vm3, %vm1490_vm9 }
 0x16c   : > { %vm1467_vm5 = vcmp.lt.s32.totalorder %v4049_v38, 384  ;;  %v1734_v16 = vadd.f32 %v1702_v6, %v1670_v17  ;;  %v1269_v27 = vadd.f32 %v1237_v33, %v4159_v61  ;;  %v837_v63 = vmul.f32 0.6931472, %v2669_v10  ;;  %v4169_v20 = vpop.eup %2672 }
 0x16d   : > { %v859_v23 = vand.u32 2147483647, %v4084_v31  ;;  %v5147_v46 = vmov 0  ;;  %v1638_v18 = vmul.f32 0.6931472, %v2667_v22  ;;  %vm1466_vm7 = vcmp.lt.s32.totalorder %v4066_v19, 384  ;;  %v2675_v33 = vpop.eup %2674  ;;  %vm4277_vm0 = vmand %vm1467_vm5, %vm1490_vm9 }
 0x16e   : > { %v5148_v46 = vsel %vm4175_vm6, 4294967295, %v5147_v46  ;;  %v1397_v17 = vadd.s32 48, %v3912_v1  ;;  %v1396_v6 = vadd.s32 40, %v3912_v1  ;;  %2694 = vlog2.f32 %v4103_v58  ;;  %2362 = vmatprep.subr.mxu0 %v1269_v27  ;;  %vm4292_vm1 = vmand %vm1466_vm7, %vm1490_vm9 }
 0x16f   : > { %5149 = vst [vmem:[#allocation44_spill] sm:$0xff] %v5148_v46  ;;  %v5150_v11 = vmov 0  ;;  %v4191_v10 = vadd.f32 %v1798_v55, %v1734_v16  ;;  %v676_v22 = vmax.f32 %v3939_v51, 0.0  ;;  %v843_v25 = vsel %vm4161_vm4, %v840_v29, %v837_v63  ;;  %v2677_v36 = vpop.eup %2676 }
 0x170   : > { %v5151_v11 = vsel %vm4187_vm8, 4294967295, %v5150_v11  ;;  %v849_v43 = vmul.f32 %v4081_v56, %v848_v42  ;;  %v5153_v57 = vmov 0  ;;  %2696 = vrcp.f32 %v3967_v48  ;;  %v2679_v56 = vpop.eup %2678 }
 0x171   : > { %5152 = vst [vmem:[#allocation45_spill] sm:$0xff] %v5151_v11  ;;  %v5154_v57 = vsel %vm4201_vm10, 4294967295, %v5153_v57  ;;  %vm4206_vm11 = vcmp.lt.f32.partialorder %v850_v2, 0.0004427343  ;;  %v858_v51 = vmul.f32 %v4084_v31, %v857_v44  ;;  %v4211_v29 = vadd.f32 %v843_v25, %v675_v59  ;;  %v2681_v48 = vpop.eup %2680 }
 0x172   : > { %5155 = vst [vmem:[#allocation46_spill] sm:$0xff] %v5154_v57  ;;  %2698 = vrcp.f32 %v4103_v58  ;;  %v677_v42 = vmax.f32 %v3948_v24, 0.0  ;;  %v846_v21 = vmul.f32 0.6931472, %v2677_v36  ;;  %vm4215_vm14 = vcmp.lt.f32.partialorder %v859_v23, 0.0004427343  ;;  %v2683_v58 = vpop.eup %2682 }
 0x173   : > { %5158 = vst [vmem:[#allocation47_spill] sm:$0xff] %v4211_v29  ;;  %v855_v31 = vmul.f32 0.6931472, %v2679_v56  ;;  %2700 = vrcp.f32 %v4211_v29  ;;  %v4231_v36 = vadd.s32 %v3919_v37, %v4128_v14  ;;  %v4236_v44 = vpop.eup %2684  ;;  %v4239_v16 = vadd.s32 %v3919_v37, %v1397_v17  ;;  %v1189_v14 = vld [vmem:[%s3500_s23 + $0x10] sm:$0xff] }
 0x174   : > { %v852_v59 = vsel %vm4206_vm11, %v849_v43, %v846_v21  ;;  %2702 = vlog2.f32 %v4211_v29  ;;  %v4242_v27 = vadd.s32 %v3919_v37, %v1396_v6  ;;  %v4249_v56 = vpop.eup %2686  ;;  %v4251_v55 = vmul.f32 2.0, %v1638_v18 }
 0x175   : > { %v861_v63 = vsel %vm4215_vm14, %v858_v51, %v855_v31  ;;  %v4246_v23 = vadd.f32 %v852_v59, %v676_v22  ;;  %v4253_v43 = vmul.f32 %v2671_v39, %v2671_v39  ;;  %v1634_v21 = vmul.f32 0.6931472, %v2681_v48  ;;  %v2689_v17 = vpop.eup %2688  ;;  %v4285_v59 = vld [vmem:[%s3378_s4 + $0x10] sm:$0xff] }
 0x176   : > { %5161 = vst [vmem:[#allocation48_spill] sm:$0xff] %v4251_v55  ;;  %v1125_v2 = vadd.f32 %v861_v63, %v677_v42  ;;  %v4256_v25 = vadd.f32 -1.0, %v3762_v62  ;;  %v1395_v6 = vadd.s32 32, %v3912_v1  ;;  %v979_v22 = vadd.f32 1.0, %v4236_v44  ;;  %v2691_v51 = vpop.eup %2690 }
 0x177   : > { %5162 = vst [vmem:[#allocation49_spill] sm:$0xff] %v4253_v43  ;;  %2704 = vrcp.f32 %v4246_v23  ;;  %v5164_v39 = vmov 0  ;;  %v4270_v18 = vadd.f32 -1.0, %v3810_v41  ;;  %v988_v42 = vadd.f32 1.0, %v4249_v56 }
 0x178   : > { %5163 = vst [vmem:[#allocation50_spill] sm:$0xff] %v4256_v25  ;;  %v5165_v39 = vsel %vm4265_vm15, 4294967295, %v5164_v39  ;;  %v1221_v62 = vmul.f32 %v1189_v14, %v1125_v2  ;;  %2706 = vrcp.f32 %v1125_v2  ;;  %v1636_v49 = vmul.f32 0.6931472, %v2675_v33  ;;  %v2693_v41 = vpop.eup %2692 }
 0x179   : > { %5166 = vst [vmem:[#allocation51_spill] sm:$0xff] %v5165_v39  ;;  %v4282_v48 = vadd.f32 -1.0, %v3864_v30  ;;  %v1706_v31 = vmul.f32 %v2683_v58, %v2683_v58  ;;  %2708 = vlog2.f32 %v4246_v23  ;;  %v1674_v63 = vmul.f32 2.0, %v1634_v21 }
 0x17a   : > { %v1394_v33 = vadd.s32 24, %v3912_v1  ;;  %v1253_v30 = vadd.f32 %v1221_v62, %v4285_v59  ;;  %2710 = vlog2.f32 %v1125_v2  ;;  %v4302_v14 = vadd.s32 %v3919_v37, %v1395_v6 }
 0x17b   : > { %v4306_v19 = vmul.f32 %v3981_v26, %v3981_v26  ;;  %2712 = vlog2.f32 %v979_v22  ;;  %v2695_v24 = vpop.eup %2694  ;;  %v4313_v2 = vmul.f32 %v4169_v20, %v4169_v20  ;;  %v1409_v62 = vadd.s32 144, %v3912_v1 }
 0x17c   : > { %2363 = vmatpush3.xpose.msra.mxu0 %v1253_v30  ;;  %2714 = vlog2.f32 %v988_v42  ;;  %v4316_v6 = vmul.f32 2.0, %v1636_v49  ;;  %v1632_v22 = vmul.f32 0.6931472, %v2691_v51  ;;  %v1392_v58 = vadd.s32 8, %v3912_v1 }
 0x17d   : > { %5171 = vst [vmem:[#allocation52_spill] sm:$0xff] %v4313_v2  ;;  %v2697_v43 = vpop.eup %2696  ;;  %v4322_v55 = vadd.f32 %v1706_v31, %v1674_v63  ;;  %v1596_v21 = vmul.f32 0.6931472, %v2693_v41  ;;  %v4325_v20 = vadd.s32 %v3919_v37, %v1394_v33  ;;  %v4329_v30 = vmul.f32 %v4131_v8, %v4131_v8 }
 0x17e   : > { %5172 = vst [vmem:[#allocation53_spill] sm:$0xff] %v4316_v6  ;;  %vm1465_vm2 = vcmp.lt.s32.totalorder %v4231_v36, 384  ;;  %v1594_v49 = vmul.f32 0.6931472, %v2695_v24  ;;  %v4334_v51 = vmul.f32 %v4159_v61, %v4159_v61  ;;  %v1393_v31 = vadd.s32 16, %v3912_v1 }
 0x17f   : > { %5173 = vst [vmem:[#allocation54_spill] sm:$0xff] %v4322_v55  ;;  %v2699_v42 = vpop.eup %2698  ;;  %v982_v41 = vmul.f32 -0.5, %v4236_v44  ;;  %v4338_v33 = vmul.f32 %v2689_v17, %v2689_v17  ;;  %vm1464_vm3 = vcmp.lt.s32.totalorder %v4239_v16, 384  ;;  %v4342_v8 = vadd.s32 %v3919_v37, %v1409_v62  ;;  %vm4389_vm14 = vmand %vm1465_vm2, %vm1490_vm9 }
 0x180   : > { %5174 = vst [vmem:[#allocation55_spill] sm:$0xff] %v4334_v51  ;;  %v2701_v63 = vpop.eup %2700  ;;  %v1424_v24 = vadd.s32 %v3919_v37, %v3912_v1  ;;  %v991_v26 = vmul.f32 -0.5, %v4249_v56  ;;  %v4348_v55 = vadd.f32 -1.0, %v3924_v60  ;;  %v4350_v2 = vmul.f32 2.0, %v1632_v22  ;;  %vm4400_vm5 = vmand %vm1464_vm3, %vm1490_vm9 }
 0x181   : > { %v2703_v61 = vpop.eup %2702  ;;  %v1687_v6 = vmul.f32 %v2697_v43, %v2697_v43  ;;  %v4353_v17 = vadd.s32 %v3919_v37, %v1392_v58  ;;  %v1655_v62 = vmul.f32 2.0, %v1596_v21  ;;  %v1683_v46 = vmul.f32 %v2701_v63, %v2701_v63 }
 0x182   : > { %v1588_v54 = vmul.f32 0.6931472, %v2703_v61  ;;  %v985_v29 = vand.u32 2147483647, %v4236_v44  ;;  %v1654_v35 = vmul.f32 2.0, %v1594_v49  ;;  %v1686_v60 = vmul.f32 %v2699_v42, %v2699_v42 }
 0x183   : > { %v1426_v22 = vadd.s32 %v3919_v37, %v1393_v31  ;;  %v983_v11 = vadd.f32 1.0, %v982_v41  ;;  %v1779_v12 = vmul.f32 %v4356_v50, %v4356_v50  ;;  %v992_v0 = vadd.f32 1.0, %v991_v26 }
 0x184   : > { %v2705_v43 = vpop.eup %2704  ;;  %v1651_v58 = vmul.f32 2.0, %v1588_v54  ;;  %2716 = vlog2.f32 %v4143_v28  ;;  %v1780_v21 = vmul.f32 %v4360_v32, %v4360_v32  ;;  %v691_v42 = vmax.f32 %v4015_v45, 0.0 }
 0x185   : > { %v2707_v13 = vpop.eup %2706  ;;  %v994_v49 = vand.u32 2147483647, %v4249_v56  ;;  %v1719_v41 = vadd.f32 %v1687_v6, %v1655_v62  ;;  %v692_v54 = vmax.f32 %v4027_v3, 0.0  ;;  %vm4373_vm11 = vcmp.lt.f32.partialorder %v985_v29, 0.0004427343 }
 0x186   : > { %v2709_v31 = vpop.eup %2708  ;;  %v1715_v63 = vadd.f32 %v1683_v46, %v1651_v58  ;;  %v1718_v50 = vadd.f32 %v1686_v60, %v1654_v35  ;;  %v1684_v57 = vmul.f32 %v2705_v43, %v2705_v43  ;;  %v984_v47 = vmul.f32 %v4236_v44, %v983_v11 }
 0x187   : > { %v2711_v26 = vpop.eup %2710  ;;  %v1590_v52 = vmul.f32 0.6931472, %v2709_v31  ;;  %v1685_v25 = vmul.f32 %v2707_v13, %v2707_v13  ;;  %v993_v46 = vmul.f32 %v4249_v56, %v992_v0  ;;  %2718 = vrcp.f32 %v4143_v28 }
 0x188   : > { %v2713_v45 = vpop.eup %2712  ;;  %v1592_v51 = vmul.f32 0.6931472, %v2711_v26  ;;  %v1811_v39 = vadd.f32 %v1779_v12, %v1715_v63  ;;  %vm4381_vm7 = vcmp.lt.f32.partialorder %v994_v49, 0.0004427343  ;;  %v1781_v0 = vmul.f32 %v4285_v59, %v4285_v59 }
 0x189   : > { %v2715_v6 = vpop.eup %2714  ;;  %v1652_v3 = vmul.f32 2.0, %v1590_v52  ;;  %v981_v29 = vmul.f32 0.6931472, %v2713_v45  ;;  %v1814_v52 = vadd.f32 %v4329_v30, %v1718_v50  ;;  %vm1460_vm2 = vcmp.lt.s32.totalorder %v1426_v22, 384 }
 0x18a   : > { %v1653_v12 = vmul.f32 2.0, %v1592_v51  ;;  %v990_v13 = vmul.f32 0.6931472, %v2715_v6  ;;  %v2290_v36 = vadd.f32 -1.0, %v1811_v39  ;;  %vm5184_vm4 = vcmp.lt.s32.totalorder %v1424_v24, 384 }
 0x18b   : > { %v1716_v11 = vadd.f32 %v1684_v57, %v1652_v3  ;;  %v987_v44 = vsel %vm4373_vm11, %v984_v47, %v981_v29  ;;  %vm4410_vm12 = vmand %vm5184_vm4, %vm1490_vm9  ;;  %v4419_v50 = vadd.f32 -1.0, %v3953_v40  ;;  %vm5187_vm3 = vcmp.lt.s32.totalorder %v4242_v27, 384 }
 0x18c   : > { %v1717_v16 = vadd.f32 %v1685_v25, %v1653_v12  ;;  %v996_v59 = vsel %vm4381_vm7, %v993_v46, %v990_v13  ;;  %v4416_v51 = vadd.f32 %v987_v44, %v691_v42  ;;  %vm4425_vm11 = vmand %vm5187_vm3, %vm1490_vm9  ;;  %v1815_v57 = vadd.f32 %v4306_v19, %v1719_v41 }
 0x18d   : > { %v1812_v39 = vadd.f32 %v1780_v21, %v1716_v11  ;;  %v4430_v25 = vadd.f32 %v996_v59, %v692_v54  ;;  %v4434_v30 = vadd.f32 %v4338_v33, %v4350_v2  ;;  %v2295_v40 = vadd.f32 -1.0, %v3972_v4  ;;  %vm4449_vm3 = vmand %vm1460_vm2, %vm1490_vm9 }
 0x18e   : > { %vm5190_vm4 = vcmp.lt.s32.totalorder %v4353_v17, 384  ;;  %v1813_v24 = vadd.f32 %v1781_v0, %v1717_v16  ;;  %2720 = vrcp.f32 %v4416_v51  ;;  %v2293_v19 = vadd.f32 -1.0, %v1814_v52 }
 0x18f   : > { %vm4441_vm7 = vmand %vm5190_vm4, %vm1490_vm9  ;;  %v2291_v4 = vadd.f32 -1.0, %v1812_v39  ;;  %v1875_v33 = vsel %vm4410_vm12, %v2290_v36, 0.0  ;;  %2722 = vrcp.f32 %v4430_v25  ;;  %v1882_v17 = vsel %vm4389_vm14, %v4348_v55, 0.0 }
 0x190   : > { %vm5195_vm4 = vcmp.lt.s32.totalorder %v4325_v20, 384  ;;  %v2292_v22 = vadd.f32 -1.0, %v1813_v24  ;;  %v1407_v43 = vadd.s32 128, %v3912_v1  ;;  %2724 = vlog2.f32 %v4416_v51 }
 0x191   : > { %vm4463_vm13 = vmand %vm5195_vm4, %vm1490_vm9  ;;  %v1881_v58 = vsel %vm4400_vm5, %v4419_v50, 0.0  ;;  %v2294_v21 = vadd.f32 -1.0, %v1815_v57  ;;  %v1876_v42 = vsel %vm4441_vm7, %v2291_v4, 0.0  ;;  %2726 = vlog2.f32 %v4430_v25  ;;  %v2717_v20 = vpop.eup %2716 }
 0x192   : > { %v1880_v49 = vsel %vm4425_vm11, %v2295_v40, 0.0  ;;  %v4478_v31 = vadd.f32 -1.0, %v4029_v34  ;;  %vm5198_vm12 = vcmp.lt.s32.totalorder %v4302_v14, 384  ;;  %v1877_v63 = vsel %vm4449_vm3, %v2292_v22, 0.0 }
 0x193   : > { %vm4484_vm2 = vmand %vm5198_vm12, %vm1490_vm9  ;;  %v1907_v54 = vadd.f32 %v1876_v42, %v1875_v33  ;;  %v1878_v61 = vsel %vm4463_vm13, %v2293_v19, 0.0  ;;  %v1408_v26 = vadd.s32 136, %v3912_v1  ;;  %v1410_v34 = vadd.s32 152, %v3912_v1 }
 0x194   : > { %v1411_v45 = vadd.s32 160, %v3912_v1  ;;  %v1412_v46 = vadd.s32 168, %v3912_v1  ;;  %v1413_v6 = vadd.s32 176, %v3912_v1  ;;  %v4499_v3 = vadd.s32 %v3919_v37, %v1407_v43  ;;  %v2719_v13 = vpop.eup %2718 }
 0x195   : > { %v1908_v14 = vadd.f32 %v1907_v54, %v1877_v63  ;;  %v1879_v29 = vsel %vm4484_vm2, %v2294_v21, 0.0  ;;  %v1624_v62 = vmul.f32 0.6931472, %v2717_v20  ;;  %v1414_v12 = vadd.s32 184, %v3912_v1  ;;  %v4558_v20 = vld [vmem:[#allocation7] sm:$0x1] }
 0x196   : > { %v1415_v0 = vadd.s32 192, %v3912_v1  ;;  %v1416_v52 = vadd.s32 200, %v3912_v1  ;;  %v1417_v11 = vadd.s32 208, %v3912_v1  ;;  %v1418_v36 = vadd.s32 216, %v3912_v1 }
 0x197   : > { %v1909_v28 = vadd.f32 %v1908_v14, %v1878_v61  ;;  %v1419_v44 = vadd.s32 224, %v3912_v1  ;;  %v1420_v56 = vadd.s32 232, %v3912_v1  ;;  %v1421_v16 = vadd.s32 240, %v3912_v1  ;;  %v4567_v61 = vld [vmem:[#allocation8] sm:$0x1] }
 0x198   : > { %v1422_v59 = vadd.s32 248, %v3912_v1  ;;  %v4519_v47 = vadd.s32 %v3919_v37, %v1408_v26  ;;  %v4522_v57 = vadd.s32 %v3919_v37, %v1410_v34  ;;  %v4525_v39 = vadd.s32 %v3919_v37, %v1411_v45 }
 0x199   : > { %v1910_v50 = vadd.f32 %v1909_v28, %v1879_v29  ;;  %v1669_v40 = vmul.f32 2.0, %v1624_v62  ;;  %v1701_v27 = vmul.f32 %v2719_v13, %v2719_v13  ;;  %v4528_v24 = vadd.s32 %v3919_v37, %v1412_v46  ;;  %v1763_v29 = vld [vmem:[%s3378_s4 + $0x80] sm:$0xff]  ;;  %v1764_v28 = vld [vmem:[%s3378_s4 + $0x88] sm:$0xff] }
 0x19a   : > { %v4531_v19 = vadd.s32 %v3919_v37, %v1413_v6  ;;  %v4534_v4 = vadd.s32 %v3919_v37, %v1414_v12  ;;  %v4537_v33 = vadd.s32 %v3919_v37, %v1415_v0  ;;  %v4540_v60 = vadd.s32 %v3919_v37, %v1416_v52  ;;  %v1188_v12 = vld [vmem:[%s3500_s23 + $0x8] sm:$0xff] }
 0x19b   : > { %v1911_v2 = vadd.f32 %v1910_v50, %v1880_v49  ;;  %v2721_v22 = vpop.eup %2720  ;;  %v4549_v43 = vadd.s32 %v3919_v37, %v1417_v11  ;;  %v4552_v21 = vadd.s32 %v3919_v37, %v1418_v36  ;;  %v4555_v42 = vadd.s32 %v3919_v37, %v1419_v44 }
 0x19c   : > { %2728 = vrcp.f32 %v3555_v7  ;;  %v2723_v49 = vpop.eup %2722  ;;  %v4561_v41 = vadd.f32 -1.0, %v4191_v10  ;;  %v4564_v54 = vadd.s32 %v3919_v37, %v1420_v56  ;;  %v1733_v34 = vadd.f32 %v1701_v27, %v1669_v40  ;;  %v1204_v10 = vld [vmem:[%s3500_s23 + $0x88] sm:$0xff] }
 0x19d   : > { %v1912_v63 = vadd.f32 %v1911_v2, %v1881_v58  ;;  %2730 = vrcp.f32 %v3532_v15  ;;  %v2725_v26 = vpop.eup %2724  ;;  %v4570_v7 = vadd.s32 %v3919_v37, %v1421_v16  ;;  %v4573_v45 = vadd.s32 %v3919_v37, %v1422_v59  ;;  %v4598_v16 = vld [vmem:[%s591_s24] sm:$0x3]  ;;  %s2950_s24 = scalar_lea.vmem %s2949_s11, 512 }
 0x19e   : > { %2732 = vrcp.f32 %v3506_v5  ;;  %v2727_v58 = vpop.eup %2726  ;;  %v1620_v46 = vmul.f32 0.6931472, %v2725_v26  ;;  %v1699_v6 = vmul.f32 %v2721_v22, %v2721_v22  ;;  %v602_v62 = vand.u32 2147483647, %v4558_v20  ;;  %p2952_p7 = scmp.lt.s32.totalorder %s2950_s24, %s2944_s28 }
 0x19f   : > { %v1913_v14 = vadd.f32 %v1912_v63, %v1882_v17  ;;  %v1622_v0 = vmul.f32 0.6931472, %v2727_v58  ;;  %2734 = vlog2.f32 %v3532_v15  ;;  %v1700_v5 = vmul.f32 %v2723_v49, %v2723_v49  ;;  %v5244_v49 = vld [vmem:[#allocation49_spill] sm:$0xff] }
 0x1a0   : > { %v618_v13 = vand.u32 2147483647, %v4567_v61  ;;  %vm1476_vm13 = vcmp.lt.s32.totalorder %v4342_v8, 384  ;;  %v5202_v55 = vsel %vm4292_vm1, %v4282_v48, 0.0  ;;  %v1667_v17 = vmul.f32 2.0, %v1620_v46  ;;  %p2953_p2 = por %p2952_p7, %p2951_p1 }
 0x1a1   : > { %v1914_v35 = vadd.f32 %v1913_v14, %v5202_v55  ;;  %v603_v52 = vsub.f32 0.0, %v602_v62  ;;  %v1236_v11 = vmul.f32 %v1204_v10, %v4430_v25  ;;  %v1668_v36 = vmul.f32 2.0, %v1622_v0  ;;  %v5207_v10 = vld [vmem:[#allocation55_spill] sm:$0xff] }
 0x1a2   : > { %v1795_v44 = vmul.f32 %v1763_v29, %v1763_v29  ;;  %v619_v56 = vsub.f32 0.0, %v618_v13  ;;  %v1220_v15 = vmul.f32 %v1188_v12, %v4246_v23  ;;  %v5203_v38 = vsel %vm4277_vm0, %v4270_v18, 0.0  ;;  %v5205_v23 = vld [vmem:[#allocation50_spill] sm:$0xff]  ;;  %v5210_v62 = vld [vmem:[#allocation43_spill] sm:$0xff]  ;;  %p2954_p3 = pnand %p2953_p2, %p2947_p9 }
 0x1a3   : > { %v1915_v59 = vadd.f32 %v1914_v35, %v5203_v38  ;;  %v1731_v48 = vadd.f32 %v1699_v6, %v1667_v17  ;;  %v604_v50 = vmul.f32 1.442695, %v603_v52  ;;  %v1268_v40 = vadd.f32 %v1764_v28, %v1236_v11  ;;  %v1187_v13 = vld [vmem:[%s3500_s23] sm:$0xff]  ;;  %s2037_s23 = scalar_lea.hbm %s5277_s10, %s2289_s30 }
 0x1a4   : > { %v1732_v27 = vadd.f32 %v1700_v5, %v1668_v36  ;;  %v1796_v2 = vmul.f32 %v1764_v28, %v1764_v28  ;;  %v620_v22 = vmul.f32 1.442695, %v619_v56  ;;  %v1252_v25 = vadd.f32 %v4360_v32, %v1220_v15  ;;  %v5208_v32 = vld [vmem:[#allocation42_spill] sm:$0xff]  ;;  %v5212_v55 = vld [vmem:[#allocation39_spill] sm:$0xff]  ;;  %v5213_v52 = vld [vmem:[#allocation36_spill] sm:$0xff] }
 0x1a5   : > { %vm1474_vm1 = vcmp.lt.s32.totalorder %v4499_v3, 384  ;;  %v5206_v63 = vsel %vm4265_vm15, %v5205_v23, 0.0  ;;  %2736 = vpow2.f32 %v604_v50  ;;  %2364 = vmatprep.subr.mxu0 %v1268_v40  ;;  %v1285_v18 = vand.u32 2147483647, %v4598_v16  ;;  %v5214_v36 = vld [vmem:[#allocation30_spill] sm:$0xff]  ;;  %v5216_v15 = vld [vmem:[#allocation40_spill] sm:$0xff] }
 0x1a6   : > { %v1916_v26 = vadd.f32 %v1915_v59, %v5206_v63  ;;  %v1829_v58 = vadd.f32 %v5207_v10, %v1733_v34  ;;  %vm1475_vm0 = vcmp.lt.s32.totalorder %v4519_v47, 384  ;;  %v1827_v14 = vadd.f32 %v1795_v44, %v1731_v48  ;;  %2365 = vmatpush3.xpose.msra.mxu0 %v1252_v25  ;;  %vm4642_vm14 = vmand %vm1474_vm1, %vm1490_vm9  ;;  %v5221_v23 = vld [vmem:[#allocation29_spill] sm:$0xff]  ;;  %v1774_v3 = vld [vmem:[%s3378_s4 + $0xd8] sm:$0xff] }
 0x1a7   : > { %2738 = vpow2.f32 %v620_v22  ;;  %vm1477_vm5 = vcmp.lt.s32.totalorder %v4522_v57, 384  ;;  %v1640_v46 = vmul.f32 0.6931472, %v5208_v32  ;;  %v5211_v12 = vsel %vm4201_vm10, %v5210_v62, 0.0  ;;  %v5227_v32 = vld [vmem:[#allocation41_spill] sm:$0xff]  ;;  %v5228_v62 = vld [vmem:[#allocation56_spill] sm:$0xff] }
 0x1a8   : > { %v1917_v0 = vadd.f32 %v1916_v26, %v5211_v12  ;;  %v1286_v5 = vsub.f32 0.0, %v1285_v18  ;;  %vm1478_vm15 = vcmp.lt.s32.totalorder %v4525_v39, 384  ;;  %v1642_v34 = vmul.f32 0.6931472, %v5212_v55  ;;  %v1769_v18 = vld [vmem:[%s3378_s4 + $0xb0] sm:$0xff]  ;;  %vm4708_vm2 = vmand %vm1477_vm5, %vm1490_vm9 }
 0x1a9   : > { %v1828_v35 = vadd.f32 %v1796_v2, %v1732_v27  ;;  %v1235_v17 = vmul.f32 %v1203_v53, %v4416_v51  ;;  %v2729_v28 = vpop.eup %2728  ;;  %v1644_v11 = vmul.f32 0.6931472, %v5213_v52  ;;  %v1646_v44 = vmul.f32 0.6931472, %v5214_v36  ;;  %v5218_v2 = vld [vmem:[#allocation47_spill] sm:$0xff]  ;;  %v5235_v36 = vld [vmem:[#allocation34_spill] sm:$0xff] }
 0x1aa   : > { %v5217_v38 = vsel %vm4187_vm8, %v5216_v15, 0.0  ;;  %v1287_v48 = vmul.f32 1.442695, %v1286_v5  ;;  %v4630_v50 = vpop.eup %2730  ;;  %v4632_v40 = vadd.f32 -1.0, %v1829_v58  ;;  %vm1479_vm10 = vcmp.lt.s32.totalorder %v4528_v24, 384  ;;  %vm4656_vm8 = vmand %vm1476_vm13, %vm1490_vm9  ;;  %v5233_v52 = vld [vmem:[#allocation35_spill] sm:$0xff] }
 0x1ab   : > { %v1918_v59 = vadd.f32 %v1917_v0, %v5217_v38  ;;  %v2306_v27 = vadd.f32 -1.0, %v1827_v14  ;;  %v1267_v51 = vadd.f32 %v1763_v29, %v1235_v17  ;;  %v1219_v22 = vmul.f32 %v1187_v13, %v5218_v2  ;;  %v4636_v25 = vpop.eup %2732  ;;  %v5223_v29 = vld [vmem:[#allocation38_spill] sm:$0xff]  ;;  %v5231_v13 = vld [vmem:[#allocation37_spill] sm:$0xff]  ;;  %v1771_v38 = vld [vmem:[%s3378_s4 + $0xc0] sm:$0xff] }
 0x1ac   : > { %v1650_v63 = vmul.f32 0.6931472, %v5221_v23  ;;  %v1677_v26 = vmul.f32 2.0, %v1640_v46  ;;  %v5224_v10 = vsel %vm4175_vm6, %v5223_v29, 0.0  ;;  %2740 = vpow2.f32 %v1287_v48  ;;  %v2735_v0 = vpop.eup %2734  ;;  %vm4668_vm6 = vmand %vm1475_vm0, %vm1490_vm9  ;;  %v1770_v17 = vld [vmem:[%s3378_s4 + $0xb8] sm:$0xff]  ;;  %v5237_v2 = vld [vmem:[#allocation53_spill] sm:$0xff] }
 0x1ad   : > { %v1919_v58 = vadd.f32 %v1918_v59, %v5224_v10  ;;  %vm1480_vm11 = vcmp.lt.s32.totalorder %v4531_v19, 384  ;;  %v1678_v14 = vmul.f32 2.0, %v1642_v34  ;;  %v1709_v46 = vmul.f32 %v5227_v32, %v5227_v32  ;;  %2366 = vmatprep.subr.mxu0 %v1267_v51  ;;  %v5232_v34 = vld [vmem:[#allocation32_spill] sm:$0xff]  ;;  %v1773_v29 = vld [vmem:[%s3378_s4 + $0xd0] sm:$0xff]  ;;  %vm4725_vm0 = vmand %vm1478_vm15, %vm1490_vm9 }
 0x1ae   : > { %v2307_v6 = vadd.f32 -1.0, %v1828_v35  ;;  %v1251_v12 = vadd.f32 %v5228_v62, %v1219_v22  ;;  %v1679_v5 = vmul.f32 2.0, %v1644_v11  ;;  %v1710_v55 = vmul.f32 %v5231_v13, %v5231_v13  ;;  %v5238_v22 = vld [vmem:[#allocation52_spill] sm:$0xff]  ;;  %v5239_v10 = vld [vmem:[#allocation33_spill] sm:$0xff]  ;;  %vm4742_vm5 = vmand %vm1479_vm10, %vm1490_vm9 }
 0x1af   : > { %v1711_v35 = vmul.f32 %v5232_v34, %v5232_v34  ;;  %vm5234_vm7 = vnez %v5233_v52  ;;  %vm1481_vm3 = vcmp.lt.s32.totalorder %v4534_v4, 384  ;;  %v1680_v47 = vmul.f32 2.0, %v1646_v44  ;;  %v1772_v53 = vld [vmem:[%s3378_s4 + $0xc8] sm:$0xff]  ;;  %v5241_v44 = vld [vmem:[#allocation31_spill] sm:$0xff]  ;;  %vm4758_vm10 = vmand %vm1480_vm11, %vm1490_vm9 }
 0x1b0   : > { %v5236_v56 = vsel %vm5234_vm7, %v5235_v36, 0.0  ;;  %v1801_v59 = vmul.f32 %v1769_v18, %v1769_v18  ;;  %v1891_v11 = vsel %vm4642_vm14, %v2306_v27, 0.0  ;;  %2367 = vmatpush3.xpose.msra.mxu0 %v1251_v12  ;;  %v1893_v48 = vsel %vm4656_vm8, %v4632_v40, 0.0  ;;  %v5243_v27 = vld [vmem:[#allocation48_spill] sm:$0xff]  ;;  %vm4773_vm8 = vmand %vm1481_vm3, %vm1490_vm9 }
 0x1b1   : > { %v1920_v15 = vadd.f32 %v1919_v58, %v5236_v56  ;;  %v4688_v51 = vmul.f32 2.0, %v1650_v63  ;;  %v1739_v23 = vadd.f32 %v5238_v22, %v5237_v2  ;;  %vm5240_vm4 = vnez %v5239_v10  ;;  %v1775_v56 = vld [vmem:[%s3378_s4 + $0xe0] sm:$0xff] }
 0x1b2   : > { %v5242_v58 = vsel %vm5240_vm4, %v5241_v44, 0.0  ;;  %vm1482_vm12 = vcmp.lt.s32.totalorder %v4537_v33, 384  ;;  %v1740_v32 = vadd.f32 %v5244_v49, %v5243_v27  ;;  %v1741_v62 = vadd.f32 %v1709_v46, %v1677_v26  ;;  %v4714_v46 = vpop.eup %2736  ;;  %v1777_v27 = vld [vmem:[%s3378_s4 + $0xf0] sm:$0xff] }
 0x1b3   : > { %v1921_v18 = vadd.f32 %v1920_v15, %v5242_v58  ;;  %v1802_v40 = vmul.f32 %v1770_v17, %v1770_v17  ;;  %v1892_v63 = vsel %vm4668_vm6, %v2307_v6, 0.0  ;;  %v1742_v13 = vadd.f32 %v1710_v55, %v1678_v14  ;;  %v1776_v15 = vld [vmem:[%s3378_s4 + $0xe8] sm:$0xff]  ;;  %vm4788_vm6 = vmand %vm1482_vm12, %vm1490_vm9 }
 0x1b4   : > { %v4712_v34 = vadd.f32 %v1711_v35, %v1679_v5  ;;  %v1803_v52 = vmul.f32 %v1771_v38, %v1771_v38  ;;  %vm1483_vm13 = vcmp.lt.s32.totalorder %v4540_v60, 384  ;;  %v1712_v6 = vmul.f32 %v2729_v28, %v2729_v28  ;;  %v4718_v36 = vpop.eup %2738 }
 0x1b5   : > { %v1922_v26 = vadd.f32 %v1921_v18, %v1891_v11  ;;  %v1804_v8 = vmul.f32 %v1772_v53, %v1772_v53  ;;  %v1805_v17 = vmul.f32 %v1773_v29, %v1773_v29  ;;  %v1833_v57 = vadd.f32 %v1801_v59, %v4434_v30  ;;  %v5249_v30 = vld [vmem:[#allocation54_spill] sm:$0xff]  ;;  %v5250_v59 = vld [vmem:[#allocation28_spill] sm:$0xff]  ;;  %vm4798_vm7 = vmand %vm1483_vm13, %vm1490_vm9 }
 0x1b6   : > { %vm1484_vm1 = vcmp.lt.s32.totalorder %v4549_v43, 384  ;;  %v1648_v5 = vmul.f32 0.6931472, %v2735_v0  ;;  %v1806_v55 = vmul.f32 %v1774_v3, %v1774_v3  ;;  %v606_v28 = vadd.f32 1.0, %v4714_v46 }
 0x1b7   : > { %v1923_v35 = vadd.f32 %v1922_v26, %v1892_v63  ;;  %v1834_v38 = vadd.f32 %v1802_v40, %v5249_v30  ;;  %v2311_v11 = vadd.f32 -1.0, %v5250_v59  ;;  %v1894_v2 = vsel %vm4708_vm2, %v4561_v41, 0.0  ;;  %vm4808_vm4 = vmand %vm1484_vm1, %vm1490_vm9 }
 0x1b8   : > { %v622_v39 = vadd.f32 1.0, %v4718_v36  ;;  %v1713_v22 = vmul.f32 %v4630_v50, %v4630_v50  ;;  %v1714_v53 = vmul.f32 %v4636_v25, %v4636_v25  ;;  %2742 = vlog2.f32 %v606_v28 }
 0x1b9   : > { %v1924_v29 = vadd.f32 %v1923_v35, %v1893_v48  ;;  %vm1485_vm15 = vcmp.lt.s32.totalorder %v4552_v21, 384  ;;  %v1835_v41 = vadd.f32 %v1803_v52, %v1739_v23  ;;  %v2312_v10 = vadd.f32 -1.0, %v1833_v57  ;;  %v4762_v18 = vpop.eup %2740 }
 0x1ba   : > { %v1895_v24 = vsel %vm4725_vm0, %v4478_v31, 0.0  ;;  %2744 = vlog2.f32 %v622_v39  ;;  %v1744_v25 = vadd.f32 %v1712_v6, %v1680_v47  ;;  %v1807_v48 = vmul.f32 %v1775_v56, %v1775_v56  ;;  %v1778_v31 = vld [vmem:[%s3378_s4 + $0xf8] sm:$0xff]  ;;  %vm4823_vm12 = vmand %vm1485_vm15, %vm1490_vm9 }
 0x1bb   : > { %v1808_v44 = vmul.f32 %v1776_v15, %v1776_v15  ;;  %v1925_v58 = vadd.f32 %v1924_v29, %v1894_v2  ;;  %vm1486_vm14 = vcmp.lt.s32.totalorder %v4555_v42, 384  ;;  %v1681_v23 = vmul.f32 2.0, %v1648_v5 }
 0x1bc   : > { %v1836_v49 = vadd.f32 %v1804_v8, %v1740_v32  ;;  %v2313_v3 = vadd.f32 -1.0, %v1834_v38  ;;  %v1896_v19 = vsel %vm4742_vm5, %v2311_v11, 0.0  ;;  %v1837_v40 = vadd.f32 %v1805_v17, %v1741_v62  ;;  %vm4841_vm13 = vmand %vm1486_vm14, %vm1490_vm9  ;;  %v633_v62 = vld [vmem:[#allocation2] sm:$0xff] }
 0x1bd   : > { %v1926_v63 = vadd.f32 %v1925_v58, %v1895_v24  ;;  %v609_v12 = vmul.f32 -0.5, %v4714_v46  ;;  %v1289_v52 = vadd.f32 1.0, %v4762_v18  ;;  %vm1487_vm11 = vcmp.lt.s32.totalorder %v4564_v54, 384 }
 0x1be   : > { %v1746_v32 = vadd.f32 %v1714_v53, %v4688_v51  ;;  %v2314_v26 = vadd.f32 -1.0, %v1835_v41  ;;  %v1897_v6 = vsel %vm4758_vm10, %v2312_v10, 0.0  ;;  %v625_v4 = vmul.f32 -0.5, %v4718_v36  ;;  %vm4857_vm5 = vmand %vm1487_vm11, %vm1490_vm9 }
 0x1bf   : > { %v1809_v8 = vmul.f32 %v1777_v27, %v1777_v27  ;;  %v1810_v17 = vmul.f32 %v1778_v31, %v1778_v31  ;;  %v1927_v57 = vadd.f32 %v1926_v63, %v1896_v19  ;;  %2746 = vlog2.f32 %v1289_v52 }
 0x1c0   : > { %v1745_v14 = vadd.f32 %v1713_v22, %v1681_v23  ;;  %v1838_v51 = vadd.f32 %v1806_v55, %v1742_v13  ;;  %v2315_v5 = vadd.f32 -1.0, %v1836_v49  ;;  %v1898_v35 = vsel %vm4773_vm8, %v2313_v3, 0.0 }
 0x1c1   : > { %v1839_v28 = vadd.f32 %v1807_v48, %v4712_v34  ;;  %v2316_v56 = vadd.f32 -1.0, %v1837_v40  ;;  %v1928_v15 = vadd.f32 %v1927_v57, %v1897_v6  ;;  %v610_v30 = vadd.f32 1.0, %v609_v12 }
 0x1c2   : > { %vm1488_vm3 = vcmp.lt.s32.totalorder %v4570_v7, 384  ;;  %v1899_v60 = vsel %vm4788_vm6, %v2314_v26, 0.0  ;;  %v612_v55 = vand.u32 2147483647, %v4714_v46  ;;  %v626_v38 = vadd.f32 1.0, %v625_v4 }
 0x1c3   : > { %v1840_v34 = vadd.f32 %v1808_v44, %v1744_v25  ;;  %v1929_v59 = vadd.f32 %v1928_v15, %v1898_v35  ;;  %v628_v11 = vand.u32 2147483647, %v4718_v36  ;;  %v1292_v2 = vmul.f32 -0.5, %v4762_v18  ;;  %vm4871_vm15 = vmand %vm1488_vm3, %vm1490_vm9 }
 0x1c4   : > { %v1841_v39 = vadd.f32 %v1809_v8, %v1745_v14  ;;  %v1842_v0 = vadd.f32 %v1810_v17, %v1746_v32  ;;  %v2317_v22 = vadd.f32 -1.0, %v1838_v51  ;;  %v1900_v43 = vsel %vm4798_vm7, %v2315_v5, 0.0  ;;  %v634_v8 = vld [vmem:[#allocation5] sm:$0xff] }
 0x1c5   : > { %v2318_v29 = vadd.f32 -1.0, %v1839_v28  ;;  %v1901_v41 = vsel %vm4808_vm4, %v2316_v56, 0.0  ;;  %v1930_v10 = vadd.f32 %v1929_v59, %v1899_v60  ;;  %v611_v24 = vmul.f32 %v4714_v46, %v610_v30  ;;  %v2743_v50 = vpop.eup %2742 }
 0x1c6   : > { %v601_v25 = vmax.f32 %v4558_v20, 0.0  ;;  %vm4831_vm2 = vcmp.lt.f32.partialorder %v612_v55, 0.0004427343  ;;  %v617_v21 = vmax.f32 %v4567_v61, 0.0  ;;  %v627_v44 = vmul.f32 %v4718_v36, %v626_v38 }
 0x1c7   : > { %v2745_v58 = vpop.eup %2744  ;;  %v1931_v46 = vadd.f32 %v1930_v10, %v1900_v43  ;;  %v608_v27 = vmul.f32 0.6931472, %v2743_v50  ;;  %vm4845_vm1 = vcmp.lt.f32.partialorder %v628_v11, 0.0004427343  ;;  %v1293_v31 = vadd.f32 1.0, %v1292_v2 }
 0x1c8   : > { %v2319_v49 = vadd.f32 -1.0, %v1840_v34  ;;  %v1902_v61 = vsel %vm4823_vm12, %v2317_v22, 0.0  ;;  %v624_v36 = vmul.f32 0.6931472, %v2745_v58  ;;  %v1295_v3 = vand.u32 2147483647, %v4762_v18 }
 0x1c9   : > { %vm1489_vm0 = vcmp.lt.s32.totalorder %v4573_v45, 384  ;;  %v1932_v19 = vadd.f32 %v1931_v46, %v1901_v41  ;;  %v614_v47 = vsel %vm4831_vm2, %v611_v24, %v608_v27  ;;  %v2320_v40 = vadd.f32 -1.0, %v1841_v39 }
 0x1ca   : > { %v1903_v63 = vsel %vm4841_vm13, %v2318_v29, 0.0  ;;  %v615_v12 = vadd.f32 %v614_v47, %v601_v25  ;;  %v630_v52 = vsel %vm4845_vm1, %v627_v44, %v624_v36  ;;  %v2321_v32 = vadd.f32 -1.0, %v1842_v0  ;;  %vm4883_vm14 = vmand %vm1489_vm0, %vm1490_vm9  ;;  %v1960_v29 = vld [vmem:[%s4903_s19] sm:$0x3] }
 0x1cb   : > { %v1933_v26 = vadd.f32 %v1932_v19, %v1902_v61  ;;  %v631_v6 = vadd.f32 %v630_v52, %v617_v21  ;;  %v1294_v4 = vmul.f32 %v4762_v18, %v1293_v31  ;;  %v1904_v57 = vsel %vm4857_vm5, %v2319_v49, 0.0 }
 0x1cc   : > { %v2747_v17 = vpop.eup %2746  ;;  %2748 = vlog2.f32 %v615_v12  ;;  %v1284_v14 = vmax.f32 %v4598_v16, 0.0  ;;  %vm1296_vm10 = vcmp.lt.f32.partialorder %v1295_v3, 0.0004427343  ;;  %v1905_v5 = vsel %vm4871_vm15, %v2320_v40, 0.0 }
 0x1cd   : > { %v1934_v51 = vadd.f32 %v1933_v26, %v1903_v63  ;;  %2750 = vlog2.f32 %v631_v6  ;;  %v1291_v18 = vmul.f32 0.6931472, %v2747_v17  ;;  %v4890_v35 = vsub.s32 0, %v3912_v1 }
 0x1ce   : > { %v632_v33 = vmul.f32 %v631_v6, %v615_v12  ;;  %v635_v16 = vmul.f32 %v634_v8, %v633_v62  ;;  %v1906_v45 = vsel %vm4883_vm14, %v2321_v32, 0.0  ;;  %v1991_v38 = vadd.f32 %v631_v6, %v615_v12 }
 0x1cf   : > { %v1935_v28 = vadd.f32 %v1934_v51, %v1904_v57  ;;  %v1297_v56 = vsel %vm1296_vm10, %v1294_v4, %v1291_v18  ;;  %vm1977_vm8 = vcmask 1040384   ;;  %v1948_v50 = vadd.s32 128, %v3922_v9  ;;  %v1300_v18 = vld [vmem:[%s596_s12] sm:$0x3] }
 0x1d0   : > { %v4894_v15 = vadd.f32 %v1297_v56, %v1284_v14  ;;  %v640_v30 = vrot.slane %v632_v33, %v4890_v35  ;;  %v1961_v48 = vmul.f32 %v1960_v29, %v1960_v29  ;;  %v1949_v44 = vadd.s32 %v3922_v9, %v3919_v37  ;;  %v1299_v33 = vld [vmem:[%s4903_s19] sm:$0x3] }
 0x1d1   : > { %v1936_v13 = vadd.f32 %v1935_v28, %v1905_v5  ;;  %v1950_v58 = vadd.s32 %v1948_v50, %v3919_v37  ;;  %v1310_v23 = vsub.s32 1, %v3912_v1 }
 0x1d2   : > { %2752 = vrcp.f32 %v4894_v15  ;;  %v642_v60 = vmul.f32 %v640_v30, %v635_v16  ;;  %v1301_v5 = vmul.f32 %v1300_v18, %v4894_v15 }
 0x1d3   : > { %v1937_v55 = vadd.f32 %v1936_v13, %v1906_v45  ;;  %2754 = vlog2.f32 %v4894_v15  ;;  %vm1952_vm11 = vcmp.lt.s32.totalorder %v1950_v58, 384 }
 0x1d4   : > { %2368 = vmatprep.mubr.f32.mxu0 %v642_v60  ;;  %v1302_v16 = vadd.f32 %v1301_v5, %v1299_v33 }
 0x1d5   : > { %1938 = vadd.xlane.f32.xlu0 %v1937_v55  ;;  %2369 = vmatmul.mubr.f32.vlgmr.msra.gmra.mxu0 %v642_v60 }
 0x1d6   : > { %v1307_v28 = vrot.slane %v1302_v16, %v4890_v35  ;;  %v1311_v56 = vrot.slane %v1302_v16, %v1310_v23 }
 0x1d9   : > { %v2749_v34 = vpop.eup %2748 }
 0x1da   : > { %v2751_v59 = vpop.eup %2750  ;;  %v1993_v11 = vmul.f32 0.6931472, %v2749_v34 }
 0x1db   : > { %v1996_v2 = vmul.f32 0.6931472, %v2751_v59 }
 0x1dc   : > { %v1994_v39 = vsub.f32 %v1991_v38, %v1993_v11 }
 0x1de   : > { %v1997_v0 = vsub.f32 %v1994_v39, %v1996_v2 }
 0x1df   : > { %v2753_v22 = vpop.eup %2752 }
 0x1e0   : > { %v2755_v43 = vpop.eup %2754  ;;  %v1998_v53 = vsel %vm1490_vm9, %v1997_v0, 0.0  ;;  %v1958_v24 = vmul.f32 %v2753_v22, %v2753_v22  ;;  %vm1951_vm9 = vcmp.lt.s32.totalorder %v1949_v44, 384 }
 0x1e1   : > { %v1999_v41 = vsel %vm1977_vm8, %v1998_v53, 0.0  ;;  %v1956_v10 = vmul.f32 0.6931472, %v2755_v43 }
 0x1e2   : > { %2000 = vadd.xlane.f32.xlu1 %v1999_v41 }
 0x1e3   : > { %v1957_v25 = vmul.f32 2.0, %v1956_v10 }
 0x1e5   : > { %v1959_v21 = vadd.f32 %v1958_v24, %v1957_v25 }
 0x1e7   : > { %v1962_v46 = vadd.f32 %v1961_v48, %v1959_v21 }
 0x1e9   : > { %v2322_v27 = vadd.f32 -1.0, %v1962_v46 }
 0x1eb   : > { %v1968_v20 = vrot.slane %v2322_v27, %v4890_v35  ;;  %v1972_v31 = vrot.slane %v2322_v27, %v1310_v23 }
 0x1ed   : > { %v1975_v49 = vsel %vm1951_vm9, %v1968_v20, 0.0  ;;  %v1976_v61 = vsel %vm1952_vm11, %v1972_v31, 0.0 }
 0x1ee   : > { %v1978_v36 = vsel %vm1977_vm8, %v1975_v49, 0.0  ;;  %v1979_v3 = vsel %vm1977_vm8, %v1976_v61, 0.0 }
 0x1ef   : > { %v1980_v42 = vadd.f32 %v1979_v3, %v1978_v36 }
 0x1f1   : > { %1981 = vadd.xlane.f32.xlu0 %v1980_v42 }
 0x25e   : > { %v1939_v9 = vpop.xlane.xlu0 %1938 }
 0x25f   : > { %v1940_v19 = vrot.slane %v1939_v9, 4 }
 0x261   : > { %v1941_v37 = vadd.f32 %v1940_v19, %v1939_v9 }
 0x263   : > { %v1942_v47 = vrot.slane %v1941_v37, 2 }
 0x265   : > { %v1943_v1 = vadd.f32 %v1942_v47, %v1941_v37 }
 0x267   : > { %v1944_v40 = vrot.slane %v1943_v1, 1 }
 0x269   : > { %v1945_v63 = vadd.f32 %v1944_v40, %v1943_v1 }
 0x26b   : > { %2370 = vpush %v1945_v63  ;;  %v2001_v12 = vpop.xlane.xlu1 %2000 }
 0x26c   : > { %v2002_v52 = vrot.slane %v2001_v12, 4 }
 0x26e   : > { %v2003_v54 = vadd.f32 %v2002_v52, %v2001_v12 }
 0x270   : > { %v2004_v32 = vrot.slane %v2003_v54, 2 }
 0x272   : > { %v2005_v62 = vadd.f32 %v2004_v32, %v2003_v54 }
 0x274   : > { %v2006_v57 = vrot.slane %v2005_v62, 1 }
 0x276   : > { %v2007_v51 = vadd.f32 %v2006_v57, %v2005_v62 }
 0x27a   : > { %v1982_v26 = vpop.xlane.xlu0 %1981 }
 0x27b   : > { %v1983_v6 = vrot.slane %v1982_v26, 4 }
 0x27d   : > { %v1984_v4 = vadd.f32 %v1983_v6, %v1982_v26 }
 0x27f   : > { %v1985_v8 = vrot.slane %v1984_v4, 2 }
 0x281   : > { %v1986_v17 = vadd.f32 %v1985_v8, %v1984_v4 }
 0x283   : > { %v1987_v14 = vrot.slane %v1986_v17, 1 }
 0x285   : > { %v1988_v7 = vadd.f32 %v1987_v14, %v1986_v17 }
 0x287   : > { %2372 = vpush %v1988_v7 }
 0x288   : > { %2374 = vpush %v2007_v51 }
 0x295   : > { %v1380_v45 = vpop.f32.mrf.mxu0 }
 0x296   : > { %v1381_v30 = vadd.f32 %v1380_v45, %v1307_v28 }
 0x297   : > { %v1382_v13 = vpop.f32.mrf.mxu0 }
 0x298   : > { %v1385_v60 = vmax.f32 %v1381_v30, 0.0  ;;  %v1383_v55 = vadd.f32 %v1382_v13, %v1311_v56 }
 0x29a   : > { %1387 = vst [vmem:[%s572_s0] sm:$0xff] %v1385_v60  ;;  %v1386_v38 = vmax.f32 %v1383_v55, 0.0 }
 0x29c   : > { %1388 = vst [vmem:[%s572_s0 + $0x8] sm:$0xff] %v1386_v38 }
 0x29d   : > { %2957 = shalt.err (!%p2954_p3)
}
 0x29e   : > { %s2958_s29 = scalar_lea.hbm %s2037_s23, 256  ;;  %s2962_s19 = scalar_lea.hbm %s5277_s10, 512 }
 0x29f   : > { %p2959_p5 = scmp.ne.s32.totalorder %s2037_s23, %s2958_s29  ;;  %p2963_p12 = scmp.lt.s32.totalorder %s2037_s23, %s5277_s10 }
 0x2a0   : > { %p2964_p4 = scmp.lt.s32.totalorder %s2962_s19, %s2958_s29 }
 0x2a1   : > { %p2960_p13 = pnand %p2959_p5, %p5278_p0 }
 0x2a2   : > { %p2965_p8 = por %p2964_p4, %p2963_p12 }
 0x2a3   : > { %p2961_p10 = pneg %p2960_p13 }
 0x2a5   : > { %p2966_p11 = pnand %p2965_p8, %p2961_p10 }
 0x2a7   : > { %2969 = shalt.err (!%p2966_p11)
}
 0x2a8   : > { %2398 = dma.vmem_to_hbm [thread:$0]  (%p5278_p0), %s2040_s14, 256, %s2037_s23, %s2020_s15   ;;  %v5280_v35 = vlaneseq }
 0x2a9   : > { %s2285_s12 = sshll.u32 %s3372_s25, 1  ;;  %s2371_s13 = spop %2370 }
 0x2aa   : > { %s2335_s0 = sshll.u32 %s3144_s21, 5  ;;  %s1947_s27 = smul.f32 0.5, %s2371_s13  ;;  %vm2016_vm6 = vcmp.lt.s32.totalorder %v5280_v35, 256 }
 0x2ab   : > { %p5279_p6 = scmp.eq.s32.totalorder %s3144_s21, 0  ;;  %s579_s24 = scalar_lea.vmem [#allocation14], %s2285_s12 }
 0x2ac   : > { %s2053_s29 = sshll.u32 %s579_s24, 4  ;;  %s5281_s14 = sld [smem:[#allocation60_spill]]  ;;  %s2054_s29 = int_to_ptr.vmem [resolvable:$true] %s2053_s29 }
 0x2ad   : > { %s2025_s15 = scalar_lea.sflag [#allocation15], %s3372_s25  ;;  %s2970_s16 = scalar_lea.vmem %s2054_s29, 32 }
 0x2ae   : > { %p2971_p9 = scmp.ne.s32.totalorder %s2054_s29, %s2970_s16  ;;  %s3062_s21 = smov [#allocation14]  }
 0x2af   : > { %s2974_s22 = sshll.u32 %s3062_s21, 4  ;;  %s2975_s22 = int_to_ptr.vmem [resolvable:$false] %s2974_s22 }
 0x2b0   : > { %p2972_p1 = pnand %p2971_p9, %p5278_p0  ;;  %s2976_s12 = scalar_lea.vmem %s2975_s22, 64 }
 0x2b1   : > { %p2977_p2 = scmp.lt.s32.totalorder %s2054_s29, %s2975_s22  ;;  %p2978_p3 = scmp.lt.s32.totalorder %s2976_s12, %s2970_s16 }
 0x2b2   : > { %s4951_s23 = scalar_lea.hbm %s5281_s14, %s2335_s0  ;;  %p2973_p7 = pneg %p2972_p1 }
 0x2b3   : > { %p2979_p5 = por %p2978_p3, %p2977_p2 }
 0x2b5   : > { %p2980_p13 = pnand %p2979_p5, %p2973_p7 }
 0x2b8   : > { %s2373_s4 = spop %2372 }
 0x2b9   : > { %s1990_s28 = smul.f32 0.5, %s2373_s4  ;;  %s2375_s20 = spop %2374 }
 0x2ba   : > { %s5295_s20 = smov (!%p5279_p6, %s2375_s20), 0.0 }
 0x2bb   : > { %s2009_s11 = sadd.f32 %s1990_s28, %s1947_s27 }
 0x2bd   : > { %s2012_s30 = sadd.f32 %s5295_s20, %s2009_s11 }
 0x2bf   : > { %v2013_v15 = vstv %s2012_s30 }
 0x2c0   : > { %2018 = vst.msk [vmem:[%s579_s24] sm:$0x3] %vm2016_vm6, %v2013_v15 }
 0x2c1   : > { %2983 = shalt.err (!%p2980_p13)
}
 0x2c2   : > { %s2984_s13 = scalar_lea.hbm %s4951_s23, 32  ;;  %s2988_s27 = scalar_lea.hbm %s5281_s14, 64 }
 0x2c3   : > { %p2985_p10 = scmp.ne.s32.totalorder %s4951_s23, %s2984_s13  ;;  %p2989_p8 = scmp.lt.s32.totalorder %s4951_s23, %s5281_s14 }
 0x2c4   : > { %p2990_p11 = scmp.lt.s32.totalorder %s2988_s27, %s2984_s13 }
 0x2c5   : > { %p2986_p12 = pnand %p2985_p10, %p5278_p0 }
 0x2c6   : > { %p2991_p6 = por %p2990_p11, %p2989_p8 }
 0x2c7   : > { %p2987_p4 = pneg %p2986_p12 }
 0x2c9   : > { %p2992_p9 = pnand %p2991_p6, %p2987_p4 }
 0x2cb   : > { %2995 = shalt.err (!%p2992_p9)
}
 0x2cc   : > { %2399 = dma.vmem_to_hbm [thread:$0]  (%p5278_p0), %s2054_s29, 32, %s4951_s23, %s2025_s15  }
 0x2cd PF: > { %s5282_s20 = sld [smem:[#allocation22_spill]] }
 0x2ce   : > { %s5283_s11 = sld [smem:[#allocation25_spill]] }
 0x2cf   : > { %s5284_s24 = sld [smem:[#allocation24_spill]] }
 0x2d3   : > { %s2065_s30 = sand.u32 1, %s5282_s20  }
 0x2d4   : > { %p5285_p1 = scmp.ne.s32.totalorder %s5283_s11, 0  ;;  %s2066_s17 = scalar_lea.sflag [#allocation4], %s2065_s30 }
 0x2d5   : > { %p5286_p7 = scmp.ge.s32.totalorder %s5284_s24, 2 }
 0x2d7   : > { %p2426_p2 = pnand %p5286_p7, %p5285_p1 }
 0x2d9   : > { %p2427_p3 = pneg %p2426_p2 }
 0x2db   : > { %3029 = dma.done.wait (%p2427_p3), %s2066_s17, 256  }
 0x2dc   : > { %3031 = vsyncadd (%p2427_p3), %s2066_s17, 4294967040  ;;  %s2075_s19 = scalar_lea.sflag [#allocation15], %s2065_s30 }
 0x2dd   : > { %3033 = dma.done.wait (%p2427_p3), %s2075_s19, 32  }
 0x2de   : > { %3035 = vsyncadd (%p2427_p3), %s2075_s19, 4294967264  ;;  %s5287_s20 = sld [smem:[#allocation26_spill]]  ;;  %s5290_s17 = smov %s3042_s18 }
 0x2df   : > { %s5288_s26 = sld [smem:[#allocation23_spill]] }
 0x2e0   : > { %s5289_s19 = sld [smem:[#allocation27_spill]] }
 0x2e4   : > { %p28_p0 = scmp.ge.s32.totalorder %s5287_s20, 4  }
 0x2e5   : > { %s5291_s18 = smov %s5288_s26 }
 0x2e6   :  { %30 = sbr.rel (!%p28_p0) target bundleno = 13 (0xd), region = 168 }
 0x2eb   :  { %2080 = vsyncpa [#allocation3], 1 }
 0x2ec   :  { %2082 = vsyncpa [#allocation3 + $0x1], 1 }
 0x2ed   :  { %2083 = vsyncpa [#allocation6], 1 }
 0x2ee   :  { %2084 = vsyncpa [#allocation9], 1 }
 0x2ef   :  { %2085 = vsyncpa [#allocation4], 1 }
 0x2f0   :  { %2087 = vsyncpa [#allocation4 + $0x1], 1 }
 0x2f1   :  { %2088 = vsyncpa [#allocation15], 1 }
 0x2f2   :  { %2090 = vsyncpa [#allocation15 + $0x1], 1 }

</bundles_post_ra>
